<compile_context>
chip_gen: v6e
topology: v6e:2x2x1
jax: 0.10.0
libtpu: 0.0.40
codegen_flags: <defaults>
</compile_context>

<pallas_src>
import functools

import jax
import jax.numpy as jnp
from jax import lax
from jax.experimental import pallas as pl
from jax.experimental.pallas import tpu as pltpu


def _round_up(x, m):
    return (x + m - 1) // m * m


# ---------------------------------------------------------------------------
# Kernel 1: LSTM recurrence over a chunk of Tc timesteps per grid step.
#   ih_ref : (Tc, Bp, 4*Hp)  precomputed x@W_ih^T + bias (per-gate padded)
#   whh_ref: (Hp, 4*Hp)      recurrent weight (per-gate padded, pre-transposed)
#   hs_ref : (Tc, Bp, Hp)    hidden states out
# ---------------------------------------------------------------------------
def _lstm_recurrence_kernel(ih_ref, h0_ref, c0_ref, whh_ref, hs_ref,
                            h_scr, c_scr, *, tc, hp):
    @pl.when(pl.program_id(0) == 0)
    def _():
        h_scr[...] = h0_ref[...]
        c_scr[...] = c0_ref[...]

    whh = whh_ref[...]  # hoisted: resident for the whole chunk

    def step(j, carry):
        h, c = carry
        # only the recurrent matmul is left inside the sequential loop
        gates = ih_ref[j] + jnp.dot(h, whh, preferred_element_type=jnp.float32)
        # PyTorch gate order i, f, g, o; slices are lane-aligned (hp % 128 == 0)
        i_g = jax.nn.sigmoid(gates[:, 0 * hp:1 * hp])
        f_g = jax.nn.sigmoid(gates[:, 1 * hp:2 * hp])
        g_g = jnp.tanh(gates[:, 2 * hp:3 * hp])
        o_g = jax.nn.sigmoid(gates[:, 3 * hp:4 * hp])
        c_new = f_g * c + i_g * g_g
        h_new = o_g * jnp.tanh(c_new)
        hs_ref[j] = h_new                      # leading-dim store (free layout)
        return (h_new, c_new)

    h, c = lax.fori_loop(0, tc, step, (h_scr[...], c_scr[...]), unroll=True)
    h_scr[...] = h
    c_scr[...] = c


# ---------------------------------------------------------------------------
# Kernel 2: output projection + log-softmax, parallel over row tiles.
#   hs_ref  : (Rt, Hp)
#   wout_ref: (Hp, Vp)
#   out_ref : (Rt, Vp)   lane-dense log-probs (padded lanes masked to -inf)
# ---------------------------------------------------------------------------
def _proj_logsoftmax_kernel(hs_ref, wout_ref, bout_ref, out_ref, *, v):
    logits = (jnp.dot(hs_ref[...], wout_ref[...],
                      preferred_element_type=jnp.float32)
              + bout_ref[...])                               # (Rt, Vp)
    lane = lax.broadcasted_iota(jnp.int32, logits.shape, 1)
    logits = jnp.where(lane < v, logits, jnp.finfo(jnp.float32).min)
    m = jnp.max(logits, axis=-1, keepdims=True)
    z = logits - m
    lse = jnp.log(jnp.sum(jnp.exp(z), axis=-1, keepdims=True))
    out_ref[...] = (z - lse).astype(out_ref.dtype)


# ---------------------------------------------------------------------------
# Wrapper: matches LSTMGenerator.forward(inp, hidden) with need_hidden=False.
# ---------------------------------------------------------------------------
@jax.jit
def lstm_generator_forward(inp, h0, c0, params):
    """inp: (B, T) int32; h0, c0: (1, B, H) float32; returns (B*T, V) log-probs."""
    f32 = jnp.float32
    emb_table = params["emb"]          # (V, E)
    w_ih = params["w_ih"]              # (4H, E)   rows ordered [i; f; g; o]
    w_hh = params["w_hh"]              # (4H, H)
    b_ih = params["b_ih"]              # (4H,)
    b_hh = params["b_hh"]              # (4H,)
    w_out = params["w_out"]            # (V, H)
    b_out = params["b_out"]            # (V,)

    emb = emb_table[inp]               # (B, T, E) -- gather is XLA glue
    if emb.ndim == 2:                  # inp was 1-D -> matches emb.unsqueeze(1)
        emb = emb[:, None, :]

    B, T, E = emb.shape
    H = h0.shape[-1]
    V = w_out.shape[0]

    Hp = _round_up(H, 128)             # lane-align the per-gate hidden dim
    Vp = _round_up(V, 128)             # lane-dense output
    Bp = _round_up(B, 8)               # sublane-align batch
    Tc = min(T, 16)                    # timesteps per grid step
    Tp = _round_up(T, Tc)

    # --- per-gate padded parameters ----------------------------------------
    wih_t = w_ih.astype(f32).T.reshape(E, 4, H)                       # (E,4,H)
    wih_p = jnp.zeros((E, 4, Hp), f32).at[:, :, :H].set(wih_t).reshape(E, 4 * Hp)
    bias = (b_ih + b_hh).astype(f32).reshape(4, H)
    bias_p = jnp.zeros((4, Hp), f32).at[:, :H].set(bias).reshape(4 * Hp)
    whh_t = w_hh.astype(f32).T.reshape(H, 4, H)                       # (H,4,H)
    whh_p = jnp.zeros((Hp, 4, Hp), f32).at[:H, :, :H].set(whh_t).reshape(Hp, 4 * Hp)

    # --- hoisted non-recurrent input matmul (one big MXU matmul, M = B*T) ---
    # produced directly time-major so the recurrence kernel needs no transpose
    ih = jnp.einsum("bte,eg->tbg", emb.astype(f32), wih_p) + bias_p   # (T,B,4Hp)
    ih_p = jnp.zeros((Tp, Bp, 4 * Hp), f32).at[:T, :B].set(ih)

    h0_p = jnp.zeros((Bp, Hp), f32).at[:B, :H].set(h0.reshape(B, H).astype(f32))
    c0_p = jnp.zeros((Bp, Hp), f32).at[:B, :H].set(c0.reshape(B, H).astype(f32))

    # --- recurrence (sequential over time chunks) ---------------------------
    hs = pl.pallas_call(
        functools.partial(_lstm_recurrence_kernel, tc=Tc, hp=Hp),
        out_shape=jax.ShapeDtypeStruct((Tp, Bp, Hp), f32),
        grid_spec=pltpu.PrefetchScalarGridSpec(
            num_scalar_prefetch=0,
            grid=(Tp // Tc,),
            in_specs=[
                pl.BlockSpec((Tc, Bp, 4 * Hp), lambda i: (i, 0, 0)),  # ih chunk
                pl.BlockSpec((Bp, Hp), lambda i: (0, 0)),             # h0
                pl.BlockSpec((Bp, Hp), lambda i: (0, 0)),             # c0
                pl.BlockSpec((Hp, 4 * Hp), lambda i: (0, 0)),         # W_hh^T
            ],
            out_specs=pl.BlockSpec((Tc, Bp, Hp), lambda i: (i, 0, 0)),
            scratch_shapes=[pltpu.VMEM((Bp, Hp), f32),                # h carry
                            pltpu.VMEM((Bp, Hp), f32)],               # c carry
        ),
        compiler_params=pltpu.CompilerParams(
            dimension_semantics=("arbitrary",),        # true recurrence
            vmem_limit_bytes=64 * 1024 * 1024),
    )(ih_p, h0_p, c0_p, whh_p)

    # Reorder the *small* H-wide activation to final row order (row = b*T + t)
    # so the big V-wide output below is written by the kernel in its final layout.
    hs_rows = jnp.transpose(hs[:T, :B], (1, 0, 2)).reshape(B * T, Hp)

    N = B * T
    Rt = min(256, _round_up(N, 8))
    Np = _round_up(N, Rt)
    hs_p = jnp.zeros((Np, Hp), f32).at[:N].set(hs_rows)

    wout_p = jnp.zeros((Hp, Vp), f32).at[:H, :V].set(w_out.astype(f32).T)
    bout_p = jnp.zeros((1, Vp), f32).at[0, :V].set(b_out.astype(f32))

    cost = pl.CostEstimate(
        flops=2 * Np * Hp * Vp,
        transcendentals=Np * Vp,
        bytes_accessed=4 * (Np * Hp + Hp * Vp + Np * Vp + Vp))

    logp = pl.pallas_call(
        functools.partial(_proj_logsoftmax_kernel, v=V),
        out_shape=jax.ShapeDtypeStruct((Np, Vp), f32),
        grid_spec=pltpu.PrefetchScalarGridSpec(
            num_scalar_prefetch=0,
            grid=(Np // Rt,),
            in_specs=[
                pl.BlockSpec((Rt, Hp), lambda i: (i, 0)),   # hidden rows
                pl.BlockSpec((Hp, Vp), lambda i: (0, 0)),   # W_out^T
                pl.BlockSpec((1, Vp), lambda i: (0, 0)),    # b_out
            ],
            out_specs=pl.BlockSpec((Rt, Vp), lambda i: (i, 0)),
        ),
        compiler_params=pltpu.CompilerParams(
            dimension_semantics=("parallel",),              # megacore-shardable
            vmem_limit_bytes=64 * 1024 * 1024),
        cost_estimate=cost,
    )(hs_p, wout_p, bout_p)

    return logp[:N, :V]                                     # (B*T, V)


# ---------------------------------------------------------------------------
# Pure-JAX reference (for correctness check).
# ---------------------------------------------------------------------------
def reference_forward(inp, h0, c0, params):
    emb = params["emb"][inp]                                # (B, T, E)
    B, T, E = emb.shape
    H = h0.shape[-1]
    w_ih, w_hh = params["w_ih"], params["w_hh"]
    b = params["b_ih"] + params["b_hh"]

    def step(carry, x_t):
        h, c = carry
        gates = x_t @ w_ih.T + h @ w_hh.T + b
        i_g = jax.nn.sigmoid(gates[:, 0 * H:1 * H])
        f_g = jax.nn.sigmoid(gates[:, 1 * H:2 * H])
        g_g = jnp.tanh(gates[:, 2 * H:3 * H])
        o_g = jax.nn.sigmoid(gates[:, 3 * H:4 * H])
        c_new = f_g * c + i_g * g_g
        h_new = o_g * jnp.tanh(c_new)
        return (h_new, c_new), h_new

    xs = jnp.transpose(emb, (1, 0, 2))                      # (T, B, E)
    (_, _), hs = jax.lax.scan(step, (h0[0], c0[0]), xs)     # hs: (T, B, H)
    out = jnp.transpose(hs, (1, 0, 2)).reshape(-1, H)       # (B*T, H)
    logits = out @ params["w_out"].T + params["b_out"]
    return jax.nn.log_softmax(logits, axis=-1)


# ---------------------------------------------------------------------------
if __name__ == "__main__":
    embedding_dim = 16
    hidden_dim = 32
    vocab_size = 20
    max_seq_len = 8
    padding_idx = 0
    batch_size = 2

    key = jax.random.PRNGKey(0)
    keys = jax.random.split(key, 10)

    def init(k, shape, std):
        return std * jax.random.normal(k, shape, dtype=jnp.float32)

    emb = init(keys[0], (vocab_size, embedding_dim), 1.0 / jnp.sqrt(vocab_size))
    emb = emb.at[padding_idx].set(0.0)   # nn.Embedding padding_idx row is zero
    params = {
        "emb": emb,
        "w_ih": init(keys[1], (4 * hidden_dim, embedding_dim), 0.05),
        "w_hh": init(keys[2], (4 * hidden_dim, hidden_dim), 0.05),
        "b_ih": init(keys[3], (4 * hidden_dim,), 0.05),
        "b_hh": init(keys[4], (4 * hidden_dim,), 0.05),
        "w_out": init(keys[5], (vocab_size, hidden_dim), 0.05),
        "b_out": init(keys[6], (vocab_size,), 0.05),
    }

    inp = jax.random.randint(keys[7], (batch_size, max_seq_len), 0, vocab_size,
                             dtype=jnp.int32)
    h0 = init(keys[8], (1, batch_size, hidden_dim), 0.1)
    c0 = init(keys[9], (1, batch_size, hidden_dim), 0.1)

    pred = jax.block_until_ready(lstm_generator_forward(inp, h0, c0, params))
    ref = jax.block_until_ready(reference_forward(inp, h0, c0, params))

    assert pred.shape == (batch_size * max_seq_len, vocab_size)
    assert jnp.allclose(pred, ref, atol=2e-4, rtol=1e-3)

    print("KERNEL_OK")
</pallas_src>

<mosaic_0001>
module attributes {stable_mosaic.version = 11 : i64} {
  func.func @_lstm_recurrence_kernel(%arg0: i32, %arg1: memref<8x8x512xf32, #tpu.memory_space<vmem>>, %arg2: memref<8x128xf32, #tpu.memory_space<vmem>>, %arg3: memref<8x128xf32, #tpu.memory_space<vmem>>, %arg4: memref<128x512xf32, #tpu.memory_space<vmem>>, %arg5: memref<8x8x128xf32, #tpu.memory_space<vmem>>, %arg6: memref<8x128xf32, #tpu.memory_space<vmem>>, %arg7: memref<8x128xf32, #tpu.memory_space<vmem>>) attributes {dimension_semantics = [#tpu.dimension_semantics<arbitrary>], iteration_bounds = array<i64: 1>, scalar_prefetch = 0 : i64, scratch_operands = 2 : i64, tpu.core_type = #tpu.core_type<tc>, window_params = [{transform_indices = @transform_0, window_bounds = array<i64: 8, 8, 512>}, {pipeline_mode = #tpu.pipeline_mode<synchronous>, transform_indices = @transform_1, window_bounds = array<i64: 8, 128>}, {pipeline_mode = #tpu.pipeline_mode<synchronous>, transform_indices = @transform_2, window_bounds = array<i64: 8, 128>}, {pipeline_mode = #tpu.pipeline_mode<synchronous>, transform_indices = @transform_3, window_bounds = array<i64: 128, 512>}, {transform_indices = @transform_4, window_bounds = array<i64: 8, 8, 128>}]} {
    %c0_i32 = arith.constant 0 : i32
    %0 = arith.cmpi eq, %arg0, %c0_i32 : i32
    %1 = arith.extui %0 : i1 to i32
    %c0_i32_0 = arith.constant 0 : i32
    %2 = arith.cmpi ne, %1, %c0_i32_0 : i32
    scf.if %2 {
      %c0_74 = arith.constant 0 : index
      %c0_75 = arith.constant 0 : index
      %280 = vector.load %arg2[%c0_74, %c0_75] : memref<8x128xf32, #tpu.memory_space<vmem>>, vector<8x128xf32>
      %c0_76 = arith.constant 0 : index
      %c0_77 = arith.constant 0 : index
      %281 = vector.load %arg6[%c0_76, %c0_77] : memref<8x128xf32, #tpu.memory_space<vmem>>, vector<8x128xf32>
      tpu.vector_store %arg6[%c0_76, %c0_77], %280 {strides = array<i32>} : memref<8x128xf32, #tpu.memory_space<vmem>>, vector<8x128xf32>,
      %c0_78 = arith.constant 0 : index
      %c0_79 = arith.constant 0 : index
      %282 = vector.load %arg3[%c0_78, %c0_79] : memref<8x128xf32, #tpu.memory_space<vmem>>, vector<8x128xf32>
      %c0_80 = arith.constant 0 : index
      %c0_81 = arith.constant 0 : index
      %283 = vector.load %arg7[%c0_80, %c0_81] : memref<8x128xf32, #tpu.memory_space<vmem>>, vector<8x128xf32>
      tpu.vector_store %arg7[%c0_80, %c0_81], %282 {strides = array<i32>} : memref<8x128xf32, #tpu.memory_space<vmem>>, vector<8x128xf32>,
    } else {
    }
    %c0 = arith.constant 0 : index
    %c0_1 = arith.constant 0 : index
    %3 = vector.load %arg4[%c0, %c0_1] : memref<128x512xf32, #tpu.memory_space<vmem>>, vector<128x512xf32>
    %c0_2 = arith.constant 0 : index
    %c0_3 = arith.constant 0 : index
    %4 = vector.load %arg6[%c0_2, %c0_3] : memref<8x128xf32, #tpu.memory_space<vmem>>, vector<8x128xf32>
    %c0_4 = arith.constant 0 : index
    %c0_5 = arith.constant 0 : index
    %5 = vector.load %arg7[%c0_4, %c0_5] : memref<8x128xf32, #tpu.memory_space<vmem>>, vector<8x128xf32>
    %c0_i32_6 = arith.constant 0 : i32
    %6 = arith.index_cast %c0_i32_6 : i32 to index
    %c0_7 = arith.constant 0 : index
    %c0_8 = arith.constant 0 : index
    %7 = vector.load %arg1[%6, %c0_7, %c0_8] : memref<8x8x512xf32, #tpu.memory_space<vmem>>, vector<1x8x512xf32>
    %8 = vector.shape_cast %7 : vector<1x8x512xf32> to vector<8x512xf32>
    %cst = arith.constant dense<0.000000e+00> : vector<8x512xf32>
    %9 = tpu.matmul %4, %3, %cst {dimension_numbers = #tpu.dot_dimension_numbers<[1], [0], [0], [1], [0, 0, 1, 1], [], []>} : vector<8x128xf32>, vector<128x512xf32>, vector<8x512xf32> -> vector<8x512xf32>
    %10 = arith.addf %8, %9 : vector<8x512xf32>
    %11 = vector.extract_strided_slice %10 {offsets = [0, 0], sizes = [8, 128], strides = [1, 1]} : vector<8x512xf32> to vector<8x128xf32>
    %12 = arith.negf %11 : vector<8x128xf32>
    %13 = math.exp %12 : vector<8x128xf32>
    %cst_9 = arith.constant 1.000000e+00 : f32
    %14 = vector.broadcast %cst_9 : f32 to vector<8x128xf32>
    %15 = arith.addf %14, %13 : vector<8x128xf32>
    %16 = arith.divf %14, %15 : vector<8x128xf32>
    %17 = vector.extract_strided_slice %10 {offsets = [0, 128], sizes = [8, 128], strides = [1, 1]} : vector<8x512xf32> to vector<8x128xf32>
    %18 = arith.negf %17 : vector<8x128xf32>
    %19 = math.exp %18 : vector<8x128xf32>
    %cst_10 = arith.constant 1.000000e+00 : f32
    %20 = vector.broadcast %cst_10 : f32 to vector<8x128xf32>
    %21 = arith.addf %20, %19 : vector<8x128xf32>
    %22 = arith.divf %20, %21 : vector<8x128xf32>
    %23 = vector.extract_strided_slice %10 {offsets = [0, 256], sizes = [8, 128], strides = [1, 1]} : vector<8x512xf32> to vector<8x128xf32>
    %24 = math.tanh %23 : vector<8x128xf32>
    %25 = vector.extract_strided_slice %10 {offsets = [0, 384], sizes = [8, 128], strides = [1, 1]} : vector<8x512xf32> to vector<8x128xf32>
    %26 = arith.negf %25 : vector<8x128xf32>
    %27 = math.exp %26 : vector<8x128xf32>
    %cst_11 = arith.constant 1.000000e+00 : f32
    %28 = vector.broadcast %cst_11 : f32 to vector<8x128xf32>
    %29 = arith.addf %28, %27 : vector<8x128xf32>
    %30 = arith.divf %28, %29 : vector<8x128xf32>
    %31 = arith.mulf %22, %5 : vector<8x128xf32>
    %32 = arith.mulf %16, %24 : vector<8x128xf32>
    %33 = arith.addf %31, %32 : vector<8x128xf32>
    %34 = math.tanh %33 : vector<8x128xf32>
    %35 = arith.mulf %30, %34 : vector<8x128xf32>
    %36 = arith.index_cast %c0_i32_6 : i32 to index
    %c0_12 = arith.constant 0 : index
    %c0_13 = arith.constant 0 : index
    %37 = vector.load %arg5[%36, %c0_12, %c0_13] : memref<8x8x128xf32, #tpu.memory_space<vmem>>, vector<1x8x128xf32>
    %38 = vector.shape_cast %37 : vector<1x8x128xf32> to vector<8x128xf32>
    %39 = vector.shape_cast %35 : vector<8x128xf32> to vector<1x8x128xf32>
    tpu.vector_store %arg5[%36, %c0_12, %c0_13], %39 {strides = array<i32>} : memref<8x8x128xf32, #tpu.memory_space<vmem>>, vector<1x8x128xf32>,
    %c1_i32 = arith.constant 1 : i32
    %40 = arith.index_cast %c1_i32 : i32 to index
    %c0_14 = arith.constant 0 : index
    %c0_15 = arith.constant 0 : index
    %41 = vector.load %arg1[%40, %c0_14, %c0_15] : memref<8x8x512xf32, #tpu.memory_space<vmem>>, vector<1x8x512xf32>
    %42 = vector.shape_cast %41 : vector<1x8x512xf32> to vector<8x512xf32>
    %cst_16 = arith.constant dense<0.000000e+00> : vector<8x512xf32>
    %43 = tpu.matmul %35, %3, %cst_16 {dimension_numbers = #tpu.dot_dimension_numbers<[1], [0], [0], [1], [0, 0, 1, 1], [], []>} : vector<8x128xf32>, vector<128x512xf32>, vector<8x512xf32> -> vector<8x512xf32>
    %44 = arith.addf %42, %43 : vector<8x512xf32>
    %45 = vector.extract_strided_slice %44 {offsets = [0, 0], sizes = [8, 128], strides = [1, 1]} : vector<8x512xf32> to vector<8x128xf32>
    %46 = arith.negf %45 : vector<8x128xf32>
    %47 = math.exp %46 : vector<8x128xf32>
    %cst_17 = arith.constant 1.000000e+00 : f32
    %48 = vector.broadcast %cst_17 : f32 to vector<8x128xf32>
    %49 = arith.addf %48, %47 : vector<8x128xf32>
    %50 = arith.divf %48, %49 : vector<8x128xf32>
    %51 = vector.extract_strided_slice %44 {offsets = [0, 128], sizes = [8, 128], strides = [1, 1]} : vector<8x512xf32> to vector<8x128xf32>
    %52 = arith.negf %51 : vector<8x128xf32>
    %53 = math.exp %52 : vector<8x128xf32>
    %cst_18 = arith.constant 1.000000e+00 : f32
    %54 = vector.broadcast %cst_18 : f32 to vector<8x128xf32>
    %55 = arith.addf %54, %53 : vector<8x128xf32>
    %56 = arith.divf %54, %55 : vector<8x128xf32>
    %57 = vector.extract_strided_slice %44 {offsets = [0, 256], sizes = [8, 128], strides = [1, 1]} : vector<8x512xf32> to vector<8x128xf32>
    %58 = math.tanh %57 : vector<8x128xf32>
    %59 = vector.extract_strided_slice %44 {offsets = [0, 384], sizes = [8, 128], strides = [1, 1]} : vector<8x512xf32> to vector<8x128xf32>
    %60 = arith.negf %59 : vector<8x128xf32>
    %61 = math.exp %60 : vector<8x128xf32>
    %cst_19 = arith.constant 1.000000e+00 : f32
    %62 = vector.broadcast %cst_19 : f32 to vector<8x128xf32>
    %63 = arith.addf %62, %61 : vector<8x128xf32>
    %64 = arith.divf %62, %63 : vector<8x128xf32>
    %65 = arith.mulf %56, %33 : vector<8x128xf32>
    %66 = arith.mulf %50, %58 : vector<8x128xf32>
    %67 = arith.addf %65, %66 : vector<8x128xf32>
    %68 = math.tanh %67 : vector<8x128xf32>
    %69 = arith.mulf %64, %68 : vector<8x128xf32>
    %70 = arith.index_cast %c1_i32 : i32 to index
    %c0_20 = arith.constant 0 : index
    %c0_21 = arith.constant 0 : index
    %71 = vector.load %arg5[%70, %c0_20, %c0_21] : memref<8x8x128xf32, #tpu.memory_space<vmem>>, vector<1x8x128xf32>
    %72 = vector.shape_cast %71 : vector<1x8x128xf32> to vector<8x128xf32>
    %73 = vector.shape_cast %69 : vector<8x128xf32> to vector<1x8x128xf32>
    tpu.vector_store %arg5[%70, %c0_20, %c0_21], %73 {strides = array<i32>} : memref<8x8x128xf32, #tpu.memory_space<vmem>>, vector<1x8x128xf32>,
    %c2_i32 = arith.constant 2 : i32
    %74 = arith.index_cast %c2_i32 : i32 to index
    %c0_22 = arith.constant 0 : index
    %c0_23 = arith.constant 0 : index
    %75 = vector.load %arg1[%74, %c0_22, %c0_23] : memref<8x8x512xf32, #tpu.memory_space<vmem>>, vector<1x8x512xf32>
    %76 = vector.shape_cast %75 : vector<1x8x512xf32> to vector<8x512xf32>
    %cst_24 = arith.constant dense<0.000000e+00> : vector<8x512xf32>
    %77 = tpu.matmul %69, %3, %cst_24 {dimension_numbers = #tpu.dot_dimension_numbers<[1], [0], [0], [1], [0, 0, 1, 1], [], []>} : vector<8x128xf32>, vector<128x512xf32>, vector<8x512xf32> -> vector<8x512xf32>
    %78 = arith.addf %76, %77 : vector<8x512xf32>
    %79 = vector.extract_strided_slice %78 {offsets = [0, 0], sizes = [8, 128], strides = [1, 1]} : vector<8x512xf32> to vector<8x128xf32>
    %80 = arith.negf %79 : vector<8x128xf32>
    %81 = math.exp %80 : vector<8x128xf32>
    %cst_25 = arith.constant 1.000000e+00 : f32
    %82 = vector.broadcast %cst_25 : f32 to vector<8x128xf32>
    %83 = arith.addf %82, %81 : vector<8x128xf32>
    %84 = arith.divf %82, %83 : vector<8x128xf32>
    %85 = vector.extract_strided_slice %78 {offsets = [0, 128], sizes = [8, 128], strides = [1, 1]} : vector<8x512xf32> to vector<8x128xf32>
    %86 = arith.negf %85 : vector<8x128xf32>
    %87 = math.exp %86 : vector<8x128xf32>
    %cst_26 = arith.constant 1.000000e+00 : f32
    %88 = vector.broadcast %cst_26 : f32 to vector<8x128xf32>
    %89 = arith.addf %88, %87 : vector<8x128xf32>
    %90 = arith.divf %88, %89 : vector<8x128xf32>
    %91 = vector.extract_strided_slice %78 {offsets = [0, 256], sizes = [8, 128], strides = [1, 1]} : vector<8x512xf32> to vector<8x128xf32>
    %92 = math.tanh %91 : vector<8x128xf32>
    %93 = vector.extract_strided_slice %78 {offsets = [0, 384], sizes = [8, 128], strides = [1, 1]} : vector<8x512xf32> to vector<8x128xf32>
    %94 = arith.negf %93 : vector<8x128xf32>
    %95 = math.exp %94 : vector<8x128xf32>
    %cst_27 = arith.constant 1.000000e+00 : f32
    %96 = vector.broadcast %cst_27 : f32 to vector<8x128xf32>
    %97 = arith.addf %96, %95 : vector<8x128xf32>
    %98 = arith.divf %96, %97 : vector<8x128xf32>
    %99 = arith.mulf %90, %67 : vector<8x128xf32>
    %100 = arith.mulf %84, %92 : vector<8x128xf32>
    %101 = arith.addf %99, %100 : vector<8x128xf32>
    %102 = math.tanh %101 : vector<8x128xf32>
    %103 = arith.mulf %98, %102 : vector<8x128xf32>
    %104 = arith.index_cast %c2_i32 : i32 to index
    %c0_28 = arith.constant 0 : index
    %c0_29 = arith.constant 0 : index
    %105 = vector.load %arg5[%104, %c0_28, %c0_29] : memref<8x8x128xf32, #tpu.memory_space<vmem>>, vector<1x8x128xf32>
    %106 = vector.shape_cast %105 : vector<1x8x128xf32> to vector<8x128xf32>
    %107 = vector.shape_cast %103 : vector<8x128xf32> to vector<1x8x128xf32>
    tpu.vector_store %arg5[%104, %c0_28, %c0_29], %107 {strides = array<i32>} : memref<8x8x128xf32, #tpu.memory_space<vmem>>, vector<1x8x128xf32>,
    %c3_i32 = arith.constant 3 : i32
    %108 = arith.index_cast %c3_i32 : i32 to index
    %c0_30 = arith.constant 0 : index
    %c0_31 = arith.constant 0 : index
    %109 = vector.load %arg1[%108, %c0_30, %c0_31] : memref<8x8x512xf32, #tpu.memory_space<vmem>>, vector<1x8x512xf32>
    %110 = vector.shape_cast %109 : vector<1x8x512xf32> to vector<8x512xf32>
    %cst_32 = arith.constant dense<0.000000e+00> : vector<8x512xf32>
    %111 = tpu.matmul %103, %3, %cst_32 {dimension_numbers = #tpu.dot_dimension_numbers<[1], [0], [0], [1], [0, 0, 1, 1], [], []>} : vector<8x128xf32>, vector<128x512xf32>, vector<8x512xf32> -> vector<8x512xf32>
    %112 = arith.addf %110, %111 : vector<8x512xf32>
    %113 = vector.extract_strided_slice %112 {offsets = [0, 0], sizes = [8, 128], strides = [1, 1]} : vector<8x512xf32> to vector<8x128xf32>
    %114 = arith.negf %113 : vector<8x128xf32>
    %115 = math.exp %114 : vector<8x128xf32>
    %cst_33 = arith.constant 1.000000e+00 : f32
    %116 = vector.broadcast %cst_33 : f32 to vector<8x128xf32>
    %117 = arith.addf %116, %115 : vector<8x128xf32>
    %118 = arith.divf %116, %117 : vector<8x128xf32>
    %119 = vector.extract_strided_slice %112 {offsets = [0, 128], sizes = [8, 128], strides = [1, 1]} : vector<8x512xf32> to vector<8x128xf32>
    %120 = arith.negf %119 : vector<8x128xf32>
    %121 = math.exp %120 : vector<8x128xf32>
    %cst_34 = arith.constant 1.000000e+00 : f32
    %122 = vector.broadcast %cst_34 : f32 to vector<8x128xf32>
    %123 = arith.addf %122, %121 : vector<8x128xf32>
    %124 = arith.divf %122, %123 : vector<8x128xf32>
    %125 = vector.extract_strided_slice %112 {offsets = [0, 256], sizes = [8, 128], strides = [1, 1]} : vector<8x512xf32> to vector<8x128xf32>
    %126 = math.tanh %125 : vector<8x128xf32>
    %127 = vector.extract_strided_slice %112 {offsets = [0, 384], sizes = [8, 128], strides = [1, 1]} : vector<8x512xf32> to vector<8x128xf32>
    %128 = arith.negf %127 : vector<8x128xf32>
    %129 = math.exp %128 : vector<8x128xf32>
    %cst_35 = arith.constant 1.000000e+00 : f32
    %130 = vector.broadcast %cst_35 : f32 to vector<8x128xf32>
    %131 = arith.addf %130, %129 : vector<8x128xf32>
    %132 = arith.divf %130, %131 : vector<8x128xf32>
    %133 = arith.mulf %124, %101 : vector<8x128xf32>
    %134 = arith.mulf %118, %126 : vector<8x128xf32>
    %135 = arith.addf %133, %134 : vector<8x128xf32>
    %136 = math.tanh %135 : vector<8x128xf32>
    %137 = arith.mulf %132, %136 : vector<8x128xf32>
    %138 = arith.index_cast %c3_i32 : i32 to index
    %c0_36 = arith.constant 0 : index
    %c0_37 = arith.constant 0 : index
    %139 = vector.load %arg5[%138, %c0_36, %c0_37] : memref<8x8x128xf32, #tpu.memory_space<vmem>>, vector<1x8x128xf32>
    %140 = vector.shape_cast %139 : vector<1x8x128xf32> to vector<8x128xf32>
    %141 = vector.shape_cast %137 : vector<8x128xf32> to vector<1x8x128xf32>
    tpu.vector_store %arg5[%138, %c0_36, %c0_37], %141 {strides = array<i32>} : memref<8x8x128xf32, #tpu.memory_space<vmem>>, vector<1x8x128xf32>,
    %c4_i32 = arith.constant 4 : i32
    %142 = arith.index_cast %c4_i32 : i32 to index
    %c0_38 = arith.constant 0 : index
    %c0_39 = arith.constant 0 : index
    %143 = vector.load %arg1[%142, %c0_38, %c0_39] : memref<8x8x512xf32, #tpu.memory_space<vmem>>, vector<1x8x512xf32>
    %144 = vector.shape_cast %143 : vector<1x8x512xf32> to vector<8x512xf32>
    %cst_40 = arith.constant dense<0.000000e+00> : vector<8x512xf32>
    %145 = tpu.matmul %137, %3, %cst_40 {dimension_numbers = #tpu.dot_dimension_numbers<[1], [0], [0], [1], [0, 0, 1, 1], [], []>} : vector<8x128xf32>, vector<128x512xf32>, vector<8x512xf32> -> vector<8x512xf32>
    %146 = arith.addf %144, %145 : vector<8x512xf32>
    %147 = vector.extract_strided_slice %146 {offsets = [0, 0], sizes = [8, 128], strides = [1, 1]} : vector<8x512xf32> to vector<8x128xf32>
    %148 = arith.negf %147 : vector<8x128xf32>
    %149 = math.exp %148 : vector<8x128xf32>
    %cst_41 = arith.constant 1.000000e+00 : f32
    %150 = vector.broadcast %cst_41 : f32 to vector<8x128xf32>
    %151 = arith.addf %150, %149 : vector<8x128xf32>
    %152 = arith.divf %150, %151 : vector<8x128xf32>
    %153 = vector.extract_strided_slice %146 {offsets = [0, 128], sizes = [8, 128], strides = [1, 1]} : vector<8x512xf32> to vector<8x128xf32>
    %154 = arith.negf %153 : vector<8x128xf32>
    %155 = math.exp %154 : vector<8x128xf32>
    %cst_42 = arith.constant 1.000000e+00 : f32
    %156 = vector.broadcast %cst_42 : f32 to vector<8x128xf32>
    %157 = arith.addf %156, %155 : vector<8x128xf32>
    %158 = arith.divf %156, %157 : vector<8x128xf32>
    %159 = vector.extract_strided_slice %146 {offsets = [0, 256], sizes = [8, 128], strides = [1, 1]} : vector<8x512xf32> to vector<8x128xf32>
    %160 = math.tanh %159 : vector<8x128xf32>
    %161 = vector.extract_strided_slice %146 {offsets = [0, 384], sizes = [8, 128], strides = [1, 1]} : vector<8x512xf32> to vector<8x128xf32>
    %162 = arith.negf %161 : vector<8x128xf32>
    %163 = math.exp %162 : vector<8x128xf32>
    %cst_43 = arith.constant 1.000000e+00 : f32
    %164 = vector.broadcast %cst_43 : f32 to vector<8x128xf32>
    %165 = arith.addf %164, %163 : vector<8x128xf32>
    %166 = arith.divf %164, %165 : vector<8x128xf32>
    %167 = arith.mulf %158, %135 : vector<8x128xf32>
    %168 = arith.mulf %152, %160 : vector<8x128xf32>
    %169 = arith.addf %167, %168 : vector<8x128xf32>
    %170 = math.tanh %169 : vector<8x128xf32>
    %171 = arith.mulf %166, %170 : vector<8x128xf32>
    %172 = arith.index_cast %c4_i32 : i32 to index
    %c0_44 = arith.constant 0 : index
    %c0_45 = arith.constant 0 : index
    %173 = vector.load %arg5[%172, %c0_44, %c0_45] : memref<8x8x128xf32, #tpu.memory_space<vmem>>, vector<1x8x128xf32>
    %174 = vector.shape_cast %173 : vector<1x8x128xf32> to vector<8x128xf32>
    %175 = vector.shape_cast %171 : vector<8x128xf32> to vector<1x8x128xf32>
    tpu.vector_store %arg5[%172, %c0_44, %c0_45], %175 {strides = array<i32>} : memref<8x8x128xf32, #tpu.memory_space<vmem>>, vector<1x8x128xf32>,
    %c5_i32 = arith.constant 5 : i32
    %176 = arith.index_cast %c5_i32 : i32 to index
    %c0_46 = arith.constant 0 : index
    %c0_47 = arith.constant 0 : index
    %177 = vector.load %arg1[%176, %c0_46, %c0_47] : memref<8x8x512xf32, #tpu.memory_space<vmem>>, vector<1x8x512xf32>
    %178 = vector.shape_cast %177 : vector<1x8x512xf32> to vector<8x512xf32>
    %cst_48 = arith.constant dense<0.000000e+00> : vector<8x512xf32>
    %179 = tpu.matmul %171, %3, %cst_48 {dimension_numbers = #tpu.dot_dimension_numbers<[1], [0], [0], [1], [0, 0, 1, 1], [], []>} : vector<8x128xf32>, vector<128x512xf32>, vector<8x512xf32> -> vector<8x512xf32>
    %180 = arith.addf %178, %179 : vector<8x512xf32>
    %181 = vector.extract_strided_slice %180 {offsets = [0, 0], sizes = [8, 128], strides = [1, 1]} : vector<8x512xf32> to vector<8x128xf32>
    %182 = arith.negf %181 : vector<8x128xf32>
    %183 = math.exp %182 : vector<8x128xf32>
    %cst_49 = arith.constant 1.000000e+00 : f32
    %184 = vector.broadcast %cst_49 : f32 to vector<8x128xf32>
    %185 = arith.addf %184, %183 : vector<8x128xf32>
    %186 = arith.divf %184, %185 : vector<8x128xf32>
    %187 = vector.extract_strided_slice %180 {offsets = [0, 128], sizes = [8, 128], strides = [1, 1]} : vector<8x512xf32> to vector<8x128xf32>
    %188 = arith.negf %187 : vector<8x128xf32>
    %189 = math.exp %188 : vector<8x128xf32>
    %cst_50 = arith.constant 1.000000e+00 : f32
    %190 = vector.broadcast %cst_50 : f32 to vector<8x128xf32>
    %191 = arith.addf %190, %189 : vector<8x128xf32>
    %192 = arith.divf %190, %191 : vector<8x128xf32>
    %193 = vector.extract_strided_slice %180 {offsets = [0, 256], sizes = [8, 128], strides = [1, 1]} : vector<8x512xf32> to vector<8x128xf32>
    %194 = math.tanh %193 : vector<8x128xf32>
    %195 = vector.extract_strided_slice %180 {offsets = [0, 384], sizes = [8, 128], strides = [1, 1]} : vector<8x512xf32> to vector<8x128xf32>
    %196 = arith.negf %195 : vector<8x128xf32>
    %197 = math.exp %196 : vector<8x128xf32>
    %cst_51 = arith.constant 1.000000e+00 : f32
    %198 = vector.broadcast %cst_51 : f32 to vector<8x128xf32>
    %199 = arith.addf %198, %197 : vector<8x128xf32>
    %200 = arith.divf %198, %199 : vector<8x128xf32>
    %201 = arith.mulf %192, %169 : vector<8x128xf32>
    %202 = arith.mulf %186, %194 : vector<8x128xf32>
    %203 = arith.addf %201, %202 : vector<8x128xf32>
    %204 = math.tanh %203 : vector<8x128xf32>
    %205 = arith.mulf %200, %204 : vector<8x128xf32>
    %206 = arith.index_cast %c5_i32 : i32 to index
    %c0_52 = arith.constant 0 : index
    %c0_53 = arith.constant 0 : index
    %207 = vector.load %arg5[%206, %c0_52, %c0_53] : memref<8x8x128xf32, #tpu.memory_space<vmem>>, vector<1x8x128xf32>
    %208 = vector.shape_cast %207 : vector<1x8x128xf32> to vector<8x128xf32>
    %209 = vector.shape_cast %205 : vector<8x128xf32> to vector<1x8x128xf32>
    tpu.vector_store %arg5[%206, %c0_52, %c0_53], %209 {strides = array<i32>} : memref<8x8x128xf32, #tpu.memory_space<vmem>>, vector<1x8x128xf32>,
    %c6_i32 = arith.constant 6 : i32
    %210 = arith.index_cast %c6_i32 : i32 to index
    %c0_54 = arith.constant 0 : index
    %c0_55 = arith.constant 0 : index
    %211 = vector.load %arg1[%210, %c0_54, %c0_55] : memref<8x8x512xf32, #tpu.memory_space<vmem>>, vector<1x8x512xf32>
    %212 = vector.shape_cast %211 : vector<1x8x512xf32> to vector<8x512xf32>
    %cst_56 = arith.constant dense<0.000000e+00> : vector<8x512xf32>
    %213 = tpu.matmul %205, %3, %cst_56 {dimension_numbers = #tpu.dot_dimension_numbers<[1], [0], [0], [1], [0, 0, 1, 1], [], []>} : vector<8x128xf32>, vector<128x512xf32>, vector<8x512xf32> -> vector<8x512xf32>
    %214 = arith.addf %212, %213 : vector<8x512xf32>
    %215 = vector.extract_strided_slice %214 {offsets = [0, 0], sizes = [8, 128], strides = [1, 1]} : vector<8x512xf32> to vector<8x128xf32>
    %216 = arith.negf %215 : vector<8x128xf32>
    %217 = math.exp %216 : vector<8x128xf32>
    %cst_57 = arith.constant 1.000000e+00 : f32
    %218 = vector.broadcast %cst_57 : f32 to vector<8x128xf32>
    %219 = arith.addf %218, %217 : vector<8x128xf32>
    %220 = arith.divf %218, %219 : vector<8x128xf32>
    %221 = vector.extract_strided_slice %214 {offsets = [0, 128], sizes = [8, 128], strides = [1, 1]} : vector<8x512xf32> to vector<8x128xf32>
    %222 = arith.negf %221 : vector<8x128xf32>
    %223 = math.exp %222 : vector<8x128xf32>
    %cst_58 = arith.constant 1.000000e+00 : f32
    %224 = vector.broadcast %cst_58 : f32 to vector<8x128xf32>
    %225 = arith.addf %224, %223 : vector<8x128xf32>
    %226 = arith.divf %224, %225 : vector<8x128xf32>
    %227 = vector.extract_strided_slice %214 {offsets = [0, 256], sizes = [8, 128], strides = [1, 1]} : vector<8x512xf32> to vector<8x128xf32>
    %228 = math.tanh %227 : vector<8x128xf32>
    %229 = vector.extract_strided_slice %214 {offsets = [0, 384], sizes = [8, 128], strides = [1, 1]} : vector<8x512xf32> to vector<8x128xf32>
    %230 = arith.negf %229 : vector<8x128xf32>
    %231 = math.exp %230 : vector<8x128xf32>
    %cst_59 = arith.constant 1.000000e+00 : f32
    %232 = vector.broadcast %cst_59 : f32 to vector<8x128xf32>
    %233 = arith.addf %232, %231 : vector<8x128xf32>
    %234 = arith.divf %232, %233 : vector<8x128xf32>
    %235 = arith.mulf %226, %203 : vector<8x128xf32>
    %236 = arith.mulf %220, %228 : vector<8x128xf32>
    %237 = arith.addf %235, %236 : vector<8x128xf32>
    %238 = math.tanh %237 : vector<8x128xf32>
    %239 = arith.mulf %234, %238 : vector<8x128xf32>
    %240 = arith.index_cast %c6_i32 : i32 to index
    %c0_60 = arith.constant 0 : index
    %c0_61 = arith.constant 0 : index
    %241 = vector.load %arg5[%240, %c0_60, %c0_61] : memref<8x8x128xf32, #tpu.memory_space<vmem>>, vector<1x8x128xf32>
    %242 = vector.shape_cast %241 : vector<1x8x128xf32> to vector<8x128xf32>
    %243 = vector.shape_cast %239 : vector<8x128xf32> to vector<1x8x128xf32>
    tpu.vector_store %arg5[%240, %c0_60, %c0_61], %243 {strides = array<i32>} : memref<8x8x128xf32, #tpu.memory_space<vmem>>, vector<1x8x128xf32>,
    %c7_i32 = arith.constant 7 : i32
    %244 = arith.index_cast %c7_i32 : i32 to index
    %c0_62 = arith.constant 0 : index
    %c0_63 = arith.constant 0 : index
    %245 = vector.load %arg1[%244, %c0_62, %c0_63] : memref<8x8x512xf32, #tpu.memory_space<vmem>>, vector<1x8x512xf32>
    %246 = vector.shape_cast %245 : vector<1x8x512xf32> to vector<8x512xf32>
    %cst_64 = arith.constant dense<0.000000e+00> : vector<8x512xf32>
    %247 = tpu.matmul %239, %3, %cst_64 {dimension_numbers = #tpu.dot_dimension_numbers<[1], [0], [0], [1], [0, 0, 1, 1], [], []>} : vector<8x128xf32>, vector<128x512xf32>, vector<8x512xf32> -> vector<8x512xf32>
    %248 = arith.addf %246, %247 : vector<8x512xf32>
    %249 = vector.extract_strided_slice %248 {offsets = [0, 0], sizes = [8, 128], strides = [1, 1]} : vector<8x512xf32> to vector<8x128xf32>
    %250 = arith.negf %249 : vector<8x128xf32>
    %251 = math.exp %250 : vector<8x128xf32>
    %cst_65 = arith.constant 1.000000e+00 : f32
    %252 = vector.broadcast %cst_65 : f32 to vector<8x128xf32>
    %253 = arith.addf %252, %251 : vector<8x128xf32>
    %254 = arith.divf %252, %253 : vector<8x128xf32>
    %255 = vector.extract_strided_slice %248 {offsets = [0, 128], sizes = [8, 128], strides = [1, 1]} : vector<8x512xf32> to vector<8x128xf32>
    %256 = arith.negf %255 : vector<8x128xf32>
    %257 = math.exp %256 : vector<8x128xf32>
    %cst_66 = arith.constant 1.000000e+00 : f32
    %258 = vector.broadcast %cst_66 : f32 to vector<8x128xf32>
    %259 = arith.addf %258, %257 : vector<8x128xf32>
    %260 = arith.divf %258, %259 : vector<8x128xf32>
    %261 = vector.extract_strided_slice %248 {offsets = [0, 256], sizes = [8, 128], strides = [1, 1]} : vector<8x512xf32> to vector<8x128xf32>
    %262 = math.tanh %261 : vector<8x128xf32>
    %263 = vector.extract_strided_slice %248 {offsets = [0, 384], sizes = [8, 128], strides = [1, 1]} : vector<8x512xf32> to vector<8x128xf32>
    %264 = arith.negf %263 : vector<8x128xf32>
    %265 = math.exp %264 : vector<8x128xf32>
    %cst_67 = arith.constant 1.000000e+00 : f32
    %266 = vector.broadcast %cst_67 : f32 to vector<8x128xf32>
    %267 = arith.addf %266, %265 : vector<8x128xf32>
    %268 = arith.divf %266, %267 : vector<8x128xf32>
    %269 = arith.mulf %260, %237 : vector<8x128xf32>
    %270 = arith.mulf %254, %262 : vector<8x128xf32>
    %271 = arith.addf %269, %270 : vector<8x128xf32>
    %272 = math.tanh %271 : vector<8x128xf32>
    %273 = arith.mulf %268, %272 : vector<8x128xf32>
    %274 = arith.index_cast %c7_i32 : i32 to index
    %c0_68 = arith.constant 0 : index
    %c0_69 = arith.constant 0 : index
    %275 = vector.load %arg5[%274, %c0_68, %c0_69] : memref<8x8x128xf32, #tpu.memory_space<vmem>>, vector<1x8x128xf32>
    %276 = vector.shape_cast %275 : vector<1x8x128xf32> to vector<8x128xf32>
    %277 = vector.shape_cast %273 : vector<8x128xf32> to vector<1x8x128xf32>
    tpu.vector_store %arg5[%274, %c0_68, %c0_69], %277 {strides = array<i32>} : memref<8x8x128xf32, #tpu.memory_space<vmem>>, vector<1x8x128xf32>,
    %c8_i32 = arith.constant 8 : i32
    %c0_70 = arith.constant 0 : index
    %c0_71 = arith.constant 0 : index
    %278 = vector.load %arg6[%c0_70, %c0_71] : memref<8x128xf32, #tpu.memory_space<vmem>>, vector<8x128xf32>
    tpu.vector_store %arg6[%c0_70, %c0_71], %273 {strides = array<i32>} : memref<8x128xf32, #tpu.memory_space<vmem>>, vector<8x128xf32>,
    %c0_72 = arith.constant 0 : index
    %c0_73 = arith.constant 0 : index
    %279 = vector.load %arg7[%c0_72, %c0_73] : memref<8x128xf32, #tpu.memory_space<vmem>>, vector<8x128xf32>
    tpu.vector_store %arg7[%c0_72, %c0_73], %271 {strides = array<i32>} : memref<8x128xf32, #tpu.memory_space<vmem>>, vector<8x128xf32>,
    return
  }
  func.func @transform_0(%arg0: i32) -> (i32, i32, i32) {
    %c0_i32 = arith.constant 0 : i32
    %c0_i32_0 = arith.constant 0 : i32
    %c0_i32_1 = arith.constant 0 : i32
    return %arg0, %c0_i32, %c0_i32_0 : i32, i32, i32
  }
  func.func @transform_1(%arg0: i32) -> (i32, i32) {
    %c0_i32 = arith.constant 0 : i32
    %c0_i32_0 = arith.constant 0 : i32
    %c0_i32_1 = arith.constant 0 : i32
    return %c0_i32, %c0_i32_0 : i32, i32
  }
  func.func @transform_2(%arg0: i32) -> (i32, i32) {
    %c0_i32 = arith.constant 0 : i32
    %c0_i32_0 = arith.constant 0 : i32
    %c0_i32_1 = arith.constant 0 : i32
    return %c0_i32, %c0_i32_0 : i32, i32
  }
  func.func @transform_3(%arg0: i32) -> (i32, i32) {
    %c0_i32 = arith.constant 0 : i32
    %c0_i32_0 = arith.constant 0 : i32
    %c0_i32_1 = arith.constant 0 : i32
    return %c0_i32, %c0_i32_0 : i32, i32
  }
  func.func @transform_4(%arg0: i32) -> (i32, i32, i32) {
    %c0_i32 = arith.constant 0 : i32
    %c0_i32_0 = arith.constant 0 : i32
    %c0_i32_1 = arith.constant 0 : i32
    return %arg0, %c0_i32, %c0_i32_0 : i32, i32, i32
  }
}

module attributes {stable_mosaic.version = 11 : i64} {
  func.func @_proj_logsoftmax_kernel(%arg0: i32, %arg1: memref<16x128xf32, #tpu.memory_space<vmem>>, %arg2: memref<128x128xf32, #tpu.memory_space<vmem>>, %arg3: memref<1x128xf32, #tpu.memory_space<vmem>>, %arg4: memref<16x128xf32, #tpu.memory_space<vmem>>) attributes {dimension_semantics = [#tpu.dimension_semantics<parallel>], iteration_bounds = array<i64: 1>, scalar_prefetch = 0 : i64, scratch_operands = 0 : i64, tpu.core_type = #tpu.core_type<tc>, window_params = [{transform_indices = @transform_0, window_bounds = array<i64: 16, 128>}, {pipeline_mode = #tpu.pipeline_mode<synchronous>, transform_indices = @transform_1, window_bounds = array<i64: 128, 128>}, {pipeline_mode = #tpu.pipeline_mode<synchronous>, transform_indices = @transform_2, window_bounds = array<i64: 1, 128>}, {transform_indices = @transform_3, window_bounds = array<i64: 16, 128>}]} {
    %c0 = arith.constant 0 : index
    %c0_0 = arith.constant 0 : index
    %0 = vector.load %arg1[%c0, %c0_0] : memref<16x128xf32, #tpu.memory_space<vmem>>, vector<16x128xf32>
    %c0_1 = arith.constant 0 : index
    %c0_2 = arith.constant 0 : index
    %1 = vector.load %arg2[%c0_1, %c0_2] : memref<128x128xf32, #tpu.memory_space<vmem>>, vector<128x128xf32>
    %cst = arith.constant dense<0.000000e+00> : vector<16x128xf32>
    %2 = tpu.matmul %0, %1, %cst {dimension_numbers = #tpu.dot_dimension_numbers<[1], [0], [0], [1], [0, 0, 1, 1], [], []>} : vector<16x128xf32>, vector<128x128xf32>, vector<16x128xf32> -> vector<16x128xf32>
    %c0_3 = arith.constant 0 : index
    %c0_4 = arith.constant 0 : index
    %3 = vector.load %arg3[%c0_3, %c0_4] : memref<1x128xf32, #tpu.memory_space<vmem>>, vector<1x128xf32>
    %4 = vector.broadcast %3 : vector<1x128xf32> to vector<16x128xf32>
    %5 = arith.addf %2, %4 : vector<16x128xf32>
    %6 = tpu.iota {dimensions = array<i32: 1>} : vector<16x128xi32>
    %c20_i32 = arith.constant 20 : i32
    %7 = vector.broadcast %c20_i32 : i32 to vector<16x128xi32>
    %8 = arith.cmpi slt, %6, %7 : vector<16x128xi32>
    %cst_5 = arith.constant -3.40282347E+38 : f32
    %9 = vector.broadcast %cst_5 : f32 to vector<16x128xf32>
    %10 = arith.select %8, %5, %9 : vector<16x128xi1>, vector<16x128xf32>
    %cst_6 = arith.constant dense<0xFF800000> : vector<16xf32>
    %11 = vector.multi_reduction <maximumf>, %10, %cst_6 [1] : vector<16x128xf32> to vector<16xf32>
    %12 = vector.shape_cast %11 : vector<16xf32> to vector<16x1xf32>
    %13 = vector.broadcast %12 : vector<16x1xf32> to vector<16x128xf32>
    %14 = arith.subf %10, %13 : vector<16x128xf32>
    %15 = math.exp %14 : vector<16x128xf32>
    %cst_7 = arith.constant dense<0.000000e+00> : vector<16xf32>
    %16 = vector.multi_reduction <add>, %15, %cst_7 [1] : vector<16x128xf32> to vector<16xf32>
    %17 = vector.shape_cast %16 : vector<16xf32> to vector<16x1xf32>
    %18 = math.log %17 : vector<16x1xf32>
    %19 = vector.broadcast %18 : vector<16x1xf32> to vector<16x128xf32>
    %20 = arith.subf %14, %19 : vector<16x128xf32>
    %c0_8 = arith.constant 0 : index
    %c0_9 = arith.constant 0 : index
    %21 = vector.load %arg4[%c0_8, %c0_9] : memref<16x128xf32, #tpu.memory_space<vmem>>, vector<16x128xf32>
    tpu.vector_store %arg4[%c0_8, %c0_9], %20 {strides = array<i32>} : memref<16x128xf32, #tpu.memory_space<vmem>>, vector<16x128xf32>,
    return
  }
  func.func @transform_0(%arg0: i32) -> (i32, i32) {
    %c0_i32 = arith.constant 0 : i32
    %c0_i32_0 = arith.constant 0 : i32
    return %arg0, %c0_i32 : i32, i32
  }
  func.func @transform_1(%arg0: i32) -> (i32, i32) {
    %c0_i32 = arith.constant 0 : i32
    %c0_i32_0 = arith.constant 0 : i32
    %c0_i32_1 = arith.constant 0 : i32
    return %c0_i32, %c0_i32_0 : i32, i32
  }
  func.func @transform_2(%arg0: i32) -> (i32, i32) {
    %c0_i32 = arith.constant 0 : i32
    %c0_i32_0 = arith.constant 0 : i32
    %c0_i32_1 = arith.constant 0 : i32
    return %c0_i32, %c0_i32_0 : i32, i32
  }
  func.func @transform_3(%arg0: i32) -> (i32, i32) {
    %c0_i32 = arith.constant 0 : i32
    %c0_i32_0 = arith.constant 0 : i32
    return %arg0, %c0_i32 : i32, i32
  }
}

</mosaic_0001>

<bundles_post_ra>
// kernel: lstm_generator_forward.3
= control target key start
LH: loop header
LB: loop body
LE: loop exit
PB: predicated region body
PF: predicated region fallthrough
CT: control target
= control target key end

     0   :  { %s328_s0 = inlined_call_operand.vmem [shape: f32[16,128], index: 0, kind: input, shape index: {}]   ;;  %s329_s1 = inlined_call_operand.vmem [shape: f32[128,128], index: 1, kind: input, shape index: {}]   ;;  %s330_s2 = inlined_call_operand.vmem [shape: f32[1,128], index: 2, kind: input, shape index: {}]   ;;  %s331_s3 = inlined_call_operand.hbm [shape: f32[16,128], index: 3, kind: output, shape index: {}]  }
   0x1   :  { %v32_v0 = vld [vmem:[%s329_s1 + $0x78] sm:$0xff]  ;;  %v31_v1 = vld [vmem:[%s329_s1 + $0x70] sm:$0xff]  ;;  %v30_v2 = vld [vmem:[%s329_s1 + $0x68] sm:$0xff] }
   0x2   :  { %177 = vmatprep.subr.mxu0 %v32_v0  ;;  %v29_v3 = vld [vmem:[%s329_s1 + $0x60] sm:$0xff]  ;;  %v28_v5 = vld [vmem:[%s329_s1 + $0x58] sm:$0xff] }
   0x3   :  { %178 = vmatpush3.msra.mxu0 %v32_v0  ;;  %v15_v4 = vld [vmem:[%s328_s0] sm:$0xff] }
   0x4   :  { %179 = vmatprep.subr.mxu0 %v31_v1  ;;  %209 = vmatprep.mubr.f32.mxu0 %v15_v4 }
   0x5   :  { %180 = vmatpush3.msra.mxu0 %v31_v1 }
   0x6   :  { %181 = vmatprep.subr.mxu0 %v30_v2 }
   0x7   :  { %182 = vmatpush3.msra.mxu0 %v30_v2 }
   0x8   :  { %8 = vsyncpa [#allocation3], 0  ;;  %183 = vmatprep.subr.mxu0 %v29_v3  ;;  %v27_v6 = vld [vmem:[%s329_s1 + $0x50] sm:$0xff]  ;;  %v26_v7 = vld [vmem:[%s329_s1 + $0x48] sm:$0xff]  ;;  %v115_v18 = vlaneseq }
   0x9   :  { %184 = vmatpush3.msra.mxu0 %v29_v3  ;;  %v25_v8 = vld [vmem:[%s329_s1 + $0x40] sm:$0xff]  ;;  %v24_v9 = vld [vmem:[%s329_s1 + $0x38] sm:$0xff]  ;;  %v23_v10 = vld [vmem:[%s329_s1 + $0x30] sm:$0xff] }
   0xa   :  { %185 = vmatprep.subr.mxu0 %v28_v5  ;;  %v22_v11 = vld [vmem:[%s329_s1 + $0x28] sm:$0xff]  ;;  %v21_v12 = vld [vmem:[%s329_s1 + $0x20] sm:$0xff]  ;;  %v20_v13 = vld [vmem:[%s329_s1 + $0x18] sm:$0xff]  ;;  %v116_v20 = vand.u32 127, %v115_v18 }
   0xb   :  { %186 = vmatpush3.msra.mxu0 %v28_v5  ;;  %v19_v14 = vld [vmem:[%s329_s1 + $0x10] sm:$0xff]  ;;  %v18_v15 = vld [vmem:[%s329_s1 + $0x8] sm:$0xff]  ;;  %v17_v16 = vld [vmem:[%s329_s1] sm:$0xff] }
   0xc   :  { %187 = vmatprep.subr.mxu0 %v27_v6  ;;  %v16_v17 = vld [vmem:[%s328_s0 + $0x8] sm:$0xff]  ;;  %v158_v21 = vld [vmem:[%s330_s2] ss:$0 sm:$0xff]  ;;  %vm117_vm0 = vcmp.lt.s32.totalorder %v116_v20, 20  ;;  %s245_s0 = smov [#allocation2]  }
   0xd   :  { %188 = vmatpush3.msra.mxu0 %v27_v6  ;;  %s147_s1 = sshll.u32 %s245_s0, 4  ;;  %s148_s1 = int_to_ptr.vmem [resolvable:$true] %s147_s1 }
   0xe   :  { %189 = vmatprep.subr.mxu0 %v26_v7  ;;  %s223_s2 = scalar_lea.vmem %s148_s1, 256  ;;  %p228_p1 = scmp.lt.s32.totalorder %s148_s1, %s148_s1 }
   0xf   :  { %190 = vmatpush3.msra.mxu0 %v26_v7  ;;  %p224_p0 = scmp.ne.s32.totalorder %s148_s1, %s223_s2  ;;  %p229_p2 = scmp.lt.s32.totalorder %s223_s2, %s223_s2 }
  0x10   :  { %191 = vmatprep.subr.mxu0 %v25_v8 }
  0x11   :  { %192 = vmatpush3.msra.mxu0 %v25_v8  ;;  %p230_p3 = por %p229_p2, %p228_p1 }
  0x12   :  { %193 = vmatprep.subr.mxu0 %v24_v9 }
  0x13   :  { %194 = vmatpush3.msra.mxu0 %v24_v9  ;;  %p231_p4 = pnand %p230_p3, %p224_p0 }
  0x14   :  { %195 = vmatprep.subr.mxu0 %v23_v10 }
  0x15   :  { %196 = vmatpush3.msra.mxu0 %v23_v10 }
  0x16   :  { %197 = vmatprep.subr.mxu0 %v22_v11 }
  0x17   :  { %198 = vmatpush3.msra.mxu0 %v22_v11 }
  0x18   :  { %199 = vmatprep.subr.mxu0 %v21_v12 }
  0x19   :  { %200 = vmatpush3.msra.mxu0 %v21_v12 }
  0x1a   :  { %201 = vmatprep.subr.mxu0 %v20_v13 }
  0x1b   :  { %202 = vmatpush3.msra.mxu0 %v20_v13 }
  0x1c   :  { %203 = vmatprep.subr.mxu0 %v19_v14 }
  0x1d   :  { %204 = vmatpush3.msra.mxu0 %v19_v14 }
  0x1e   :  { %205 = vmatprep.subr.mxu0 %v18_v15 }
  0x1f   :  { %206 = vmatpush3.msra.mxu0 %v18_v15 }
  0x20   :  { %207 = vmatprep.subr.mxu0 %v17_v16 }
  0x21   :  { %208 = vmatpush3.msra.mxu0 %v17_v16 }
  0x22   :  { %210 = vmatmul.mubr.f32.vlgmr.msra.gmra.mxu0 %v16_v17 }
  0xe2   :  { %v211_v19 = vpop.f32.mrf.mxu0 }
  0xe3   :  { %v112_v24 = vadd.f32 %v211_v19, %v158_v21 }
  0xe4   :  { %v106_v22 = vpop.f32.mrf.mxu0 }
  0xe5   :  { %v107_v23 = vadd.f32 %v158_v21, %v106_v22  ;;  %v119_v26 = vsel %vm117_vm0, %v112_v24, -3.4028235e+38 }
  0xe7   :  { %v118_v25 = vsel %vm117_vm0, %v107_v23, -3.4028235e+38 }
  0xe8   :  { %120 = vmax.xlane.f32.xlu0 %v118_v25 }
  0xec   :  { %122 = vmax.xlane.f32.xlu0 %v119_v26 }
 0x171   :  { %v121_v27 = vpop.xlane.xlu0 %120 }
 0x172   :  { %v124_v28 = vsub.f32 %v118_v25, %v121_v27 }
 0x174   :  { %v126_v29 = vmul.f32 1.442695, %v124_v28 }
 0x175   :  { %v123_v30 = vpop.xlane.xlu0 %122 }
 0x176   :  { %v125_v31 = vsub.f32 %v119_v26, %v123_v30  ;;  %215 = vpow2.f32 %v126_v29 }
 0x178   :  { %v128_v32 = vmul.f32 1.442695, %v125_v31 }
 0x17a   :  { %217 = vpow2.f32 %v128_v32 }
 0x183   :  { %v216_v33 = vpop.eup %215 }
 0x184   :  { %130 = vadd.xlane.f32.xlu1 %v216_v33 }
 0x187   :  { %v218_v34 = vpop.eup %217 }
 0x188   :  { %132 = vadd.xlane.f32.xlu1 %v218_v34 }
 0x20d   :  { %v131_v35 = vpop.xlane.xlu1 %130 }
 0x20e   :  { %219 = vlog2.f32 %v131_v35 }
 0x211   :  { %v133_v36 = vpop.xlane.xlu1 %132 }
 0x212   :  { %221 = vlog2.f32 %v133_v36 }
 0x21b   :  { %v220_v37 = vpop.eup %219 }
 0x21c   :  { %v135_v38 = vmul.f32 0.6931472, %v220_v37 }
 0x21e   :  { %v138_v39 = vsub.f32 %v124_v28, %v135_v38 }
 0x21f   :  { %v222_v40 = vpop.eup %221 }
 0x220   :  { %140 = vst [vmem:[#allocation2] sm:$0xff] %v138_v39  ;;  %v137_v41 = vmul.f32 0.6931472, %v222_v40 }
 0x222   :  { %v139_v42 = vsub.f32 %v125_v31, %v137_v41 }
 0x224   :  { %141 = vst [vmem:[#allocation2 + $0x8] sm:$0xff] %v139_v42 }
 0x225   :  { %234 = shalt.err (!%p231_p4)
}
 0x226   :  { %s246_s23 = smov 128   ;;  %s247_s24 = smov 8  }
 0x227   :  { %153 = dma.vmem_to_hbm [thread:$0]  %s148_s1, 256, %s331_s3, [#allocation3], %s246_s23, %s246_s23, %s247_s24  }
 0x228   :  { %243 = dma.done.wait [#allocation3], 256  }
 0x229   :  { %244 = vsyncadd [#allocation3], 4294967040 }
 0x22a   :  { %157 = vsyncpa [#allocation3], 1 }

// kernel: lstm_generator_forward.2
= control target key start
LH: loop header
LB: loop body
LE: loop exit
PB: predicated region body
PF: predicated region fallthrough
CT: control target
= control target key end

     0   :  { %v3112_v3 = vmov 0.0   ;;  %s3107_s3 = inlined_call_operand.vmem [shape: f32[128,512], index: 3, kind: input, shape index: {}]   ;;  %s3108_s1 = inlined_call_operand.vmem [shape: f32[8,128], index: 1, kind: input, shape index: {}]   ;;  %s3109_s0 = inlined_call_operand.vmem [shape: f32[8,8,512], index: 0, kind: input, shape index: {}]   ;;  %s3110_s2 = inlined_call_operand.vmem [shape: f32[8,128], index: 2, kind: input, shape index: {}]   ;;  %s3111_s4 = inlined_call_operand.vmem [shape: f32[8,8,128], index: 4, kind: output, shape index: {}]  }
   0x1   :  { %v1792_v0 = vld [vmem:[%s3107_s3 + $0x1e8] sm:$0xff]  ;;  %v1797_v1 = vld [vmem:[%s3107_s3 + $0x1e0] sm:$0xff]  ;;  %159 = vmatprep.mubr.f32.mxu0 %v3112_v3  ;;  %230 = vmatprep.mubr.f32.mxu1 %v3112_v3  ;;  %v1839_v9 = vld [vmem:[%s3107_s3 + $0x1f8] sm:$0xff] }
   0x2   :  { %3181 = vst [vmem:[#allocation4_spill] sm:$0xff] %v1792_v0  ;;  %v1802_v2 = vld [vmem:[%s3107_s3 + $0x1c8] sm:$0xff]  ;;  %95 = vmatprep.subr.mxu0 %v1792_v0  ;;  %v1810_v4 = vld [vmem:[%s3107_s3 + $0x1c0] sm:$0xff]  ;;  %3182 = vst [vmem:[#allocation5_spill] sm:$0xff] %v1839_v9  ;;  %166 = vmatprep.subr.mxu1 %v1839_v9 }
   0x3   :  { %96 = vmatpush1.msra.mxu0 %v1797_v1  ;;  %v1816_v5 = vld [vmem:[%s3107_s3 + $0x1a8] sm:$0xff]  ;;  %v1822_v6 = vld [vmem:[%s3107_s3 + $0x1a0] sm:$0xff]  ;;  %v1851_v11 = vld [vmem:[%s3107_s3 + $0x1f0] sm:$0xff] }
   0x4   :  { %97 = vmatprep.subr.mxu0 %v1802_v2  ;;  %v1828_v7 = vld [vmem:[%s3107_s3 + $0x188] sm:$0xff]  ;;  %v1834_v8 = vld [vmem:[%s3107_s3 + $0x180] sm:$0xff]  ;;  %167 = vmatpush1.msra.mxu1 %v1851_v11  ;;  %v1863_v13 = vld [vmem:[%s3107_s3 + $0x1d8] sm:$0xff] }
   0x5   :  { %98 = vmatpush1.msra.mxu0 %v1810_v4  ;;  %v1845_v10 = vld [vmem:[%s3107_s3 + $0x168] sm:$0xff]  ;;  %v1857_v12 = vld [vmem:[%s3107_s3 + $0x160] sm:$0xff]  ;;  %v1868_v14 = vld [vmem:[%s3107_s3 + $0x1d0] sm:$0xff]  ;;  %168 = vmatprep.subr.mxu1 %v1863_v13 }
   0x6   :  { %99 = vmatprep.subr.mxu0 %v1816_v5  ;;  %v1874_v15 = vld [vmem:[%s3107_s3 + $0x148] sm:$0xff]  ;;  %v1880_v16 = vld [vmem:[%s3107_s3 + $0x1b8] sm:$0xff]  ;;  %v1886_v17 = vld [vmem:[%s3107_s3 + $0x140] sm:$0xff]  ;;  %169 = vmatpush1.msra.mxu1 %v1868_v14 }
   0x7   :  { %100 = vmatpush1.msra.mxu0 %v1822_v6  ;;  %v1892_v18 = vld [vmem:[%s3107_s3 + $0x1b0] sm:$0xff]  ;;  %v1897_v19 = vld [vmem:[%s3107_s3 + $0x198] sm:$0xff]  ;;  %v1903_v20 = vld [vmem:[%s3107_s3 + $0x128] sm:$0xff]  ;;  %170 = vmatprep.subr.mxu1 %v1880_v16 }
   0x8   :  { %101 = vmatprep.subr.mxu0 %v1828_v7  ;;  %v1909_v21 = vld [vmem:[%s3107_s3 + $0x190] sm:$0xff]  ;;  %v1915_v22 = vld [vmem:[%s3107_s3 + $0x120] sm:$0xff]  ;;  %171 = vmatpush1.msra.mxu1 %v1892_v18  ;;  %v1921_v23 = vld [vmem:[%s3107_s3 + $0x178] sm:$0xff] }
   0x9   :  { %102 = vmatpush1.msra.mxu0 %v1834_v8  ;;  %v1927_v24 = vld [vmem:[%s3107_s3 + $0x108] sm:$0xff]  ;;  %172 = vmatprep.subr.mxu1 %v1897_v19  ;;  %v1933_v25 = vld [vmem:[%s3107_s3 + $0x170] sm:$0xff]  ;;  %v1939_v26 = vld [vmem:[%s3107_s3 + $0x100] sm:$0xff] }
   0xa   :  { %103 = vmatprep.subr.mxu0 %v1845_v10  ;;  %173 = vmatpush1.msra.mxu1 %v1909_v21  ;;  %v1945_v27 = vld [vmem:[%s3107_s3 + $0x158] sm:$0xff]  ;;  %v1951_v28 = vld [vmem:[%s3107_s3 + $0xe8] sm:$0xff]  ;;  %v1957_v29 = vld [vmem:[%s3107_s3 + $0x150] sm:$0xff] }
   0xb   :  { %104 = vmatpush1.msra.mxu0 %v1857_v12  ;;  %174 = vmatprep.subr.mxu1 %v1921_v23  ;;  %v1963_v30 = vld [vmem:[%s3107_s3 + $0xe0] sm:$0xff]  ;;  %v1969_v31 = vld [vmem:[%s3107_s3 + $0x138] sm:$0xff]  ;;  %v1975_v32 = vld [vmem:[%s3107_s3 + $0xc8] sm:$0xff] }
   0xc   :  { %105 = vmatprep.subr.mxu0 %v1874_v15  ;;  %175 = vmatpush1.msra.mxu1 %v1933_v25  ;;  %v1981_v33 = vld [vmem:[%s3107_s3 + $0x130] sm:$0xff]  ;;  %v1987_v34 = vld [vmem:[%s3107_s3 + $0xc0] sm:$0xff]  ;;  %v1993_v35 = vld [vmem:[%s3107_s3 + $0x118] sm:$0xff] }
   0xd   :  { %106 = vmatpush1.msra.mxu0 %v1886_v17  ;;  %176 = vmatprep.subr.mxu1 %v1945_v27  ;;  %v1999_v36 = vld [vmem:[%s3107_s3 + $0xa8] sm:$0xff]  ;;  %v2005_v37 = vld [vmem:[%s3107_s3 + $0x110] sm:$0xff]  ;;  %v2011_v38 = vld [vmem:[%s3107_s3 + $0xa0] sm:$0xff] }
   0xe   :  { %107 = vmatprep.subr.mxu0 %v1903_v20  ;;  %177 = vmatpush1.msra.mxu1 %v1957_v29  ;;  %v2017_v39 = vld [vmem:[%s3107_s3 + $0xf8] sm:$0xff]  ;;  %v2023_v40 = vld [vmem:[%s3107_s3 + $0x88] sm:$0xff]  ;;  %v2029_v41 = vld [vmem:[%s3107_s3 + $0xf0] sm:$0xff] }
   0xf   :  { %108 = vmatpush1.msra.mxu0 %v1915_v22  ;;  %178 = vmatprep.subr.mxu1 %v1969_v31  ;;  %v2035_v42 = vld [vmem:[%s3107_s3 + $0x80] sm:$0xff]  ;;  %v2041_v43 = vld [vmem:[%s3107_s3 + $0xd8] sm:$0xff]  ;;  %v2047_v44 = vld [vmem:[%s3107_s3 + $0x68] sm:$0xff] }
  0x10   :  { %109 = vmatprep.subr.mxu0 %v1927_v24  ;;  %179 = vmatpush1.msra.mxu1 %v1981_v33  ;;  %3183 = vst [vmem:[#allocation6_spill] sm:$0xff] %v2047_v44  ;;  %v2053_v45 = vld [vmem:[%s3107_s3 + $0xd0] sm:$0xff]  ;;  %v2059_v46 = vld [vmem:[%s3107_s3 + $0x60] sm:$0xff]  ;;  %v2065_v47 = vld [vmem:[%s3107_s3 + $0xb8] sm:$0xff] }
  0x11   :  { %110 = vmatpush1.msra.mxu0 %v1939_v26  ;;  %180 = vmatprep.subr.mxu1 %v1993_v35  ;;  %3184 = vst [vmem:[#allocation7_spill] sm:$0xff] %v2059_v46  ;;  %v2071_v48 = vld [vmem:[%s3107_s3 + $0x48] sm:$0xff]  ;;  %v2077_v49 = vld [vmem:[%s3107_s3 + $0xb0] sm:$0xff]  ;;  %v2083_v50 = vld [vmem:[%s3107_s3 + $0x40] sm:$0xff] }
  0x12   :  { %111 = vmatprep.subr.mxu0 %v1951_v28  ;;  %181 = vmatpush1.msra.mxu1 %v2005_v37  ;;  %3185 = vst [vmem:[#allocation8_spill] sm:$0xff] %v2071_v48  ;;  %3186 = vst [vmem:[#allocation9_spill] sm:$0xff] %v2083_v50  ;;  %v2089_v51 = vld [vmem:[%s3107_s3 + $0x98] sm:$0xff]  ;;  %v2095_v52 = vld [vmem:[%s3107_s3 + $0x28] sm:$0xff] }
  0x13   :  { %112 = vmatpush1.msra.mxu0 %v1963_v30  ;;  %182 = vmatprep.subr.mxu1 %v2017_v39  ;;  %3187 = vst [vmem:[#allocation10_spill] sm:$0xff] %v2095_v52  ;;  %v2101_v53 = vld [vmem:[%s3107_s3 + $0x90] sm:$0xff]  ;;  %v2107_v54 = vld [vmem:[%s3107_s3 + $0x20] sm:$0xff]  ;;  %v2113_v55 = vld [vmem:[%s3107_s3 + $0x78] sm:$0xff] }
  0x14   :  { %113 = vmatprep.subr.mxu0 %v1975_v32  ;;  %183 = vmatpush1.msra.mxu1 %v2029_v41  ;;  %3188 = vst [vmem:[#allocation11_spill] sm:$0xff] %v2107_v54  ;;  %3189 = vst [vmem:[#allocation12_spill] sm:$0xff] %v2113_v55  ;;  %v2119_v56 = vld [vmem:[%s3107_s3 + $0x8] sm:$0xff]  ;;  %v2125_v57 = vld [vmem:[%s3107_s3 + $0x70] sm:$0xff] }
  0x15   :  { %114 = vmatpush1.msra.mxu0 %v1987_v34  ;;  %184 = vmatprep.subr.mxu1 %v2041_v43  ;;  %3190 = vst [vmem:[#allocation13_spill] sm:$0xff] %v2119_v56  ;;  %3191 = vst [vmem:[#allocation14_spill] sm:$0xff] %v2125_v57  ;;  %v2131_v58 = vld [vmem:[%s3107_s3] sm:$0xff]  ;;  %v2137_v59 = vld [vmem:[%s3107_s3 + $0x58] sm:$0xff] }
  0x16   :  { %115 = vmatprep.subr.mxu0 %v1999_v36  ;;  %185 = vmatpush1.msra.mxu1 %v2053_v45  ;;  %3192 = vst [vmem:[#allocation15_spill] sm:$0xff] %v2131_v58  ;;  %3193 = vst [vmem:[#allocation16_spill] sm:$0xff] %v2137_v59  ;;  %v21_v60 = vld [vmem:[%s3108_s1] sm:$0xff]  ;;  %v2147_v61 = vld [vmem:[%s3107_s3 + $0x50] sm:$0xff] }
  0x17   :  { %116 = vmatpush1.msra.mxu0 %v2011_v38  ;;  %186 = vmatprep.subr.mxu1 %v2065_v47  ;;  %3194 = vst [vmem:[#allocation17_spill] sm:$0xff] %v2147_v61  ;;  %v2154_v62 = vld [vmem:[%s3107_s3 + $0x38] sm:$0xff]  ;;  %v2161_v63 = vld [vmem:[%s3107_s3 + $0x30] sm:$0xff] }
  0x18   :  { %117 = vmatprep.subr.mxu0 %v2023_v40  ;;  %187 = vmatpush1.msra.mxu1 %v2077_v49  ;;  %3195 = vst [vmem:[#allocation18_spill] sm:$0xff] %v2154_v62  ;;  %3196 = vst [vmem:[#allocation19_spill] sm:$0xff] %v2161_v63  ;;  %v2167_v3 = vld [vmem:[%s3107_s3 + $0x18] sm:$0xff] }
  0x19   :  { %118 = vmatpush1.msra.mxu0 %v2035_v42  ;;  %188 = vmatprep.subr.mxu1 %v2089_v51  ;;  %3197 = vst [vmem:[#allocation20_spill] sm:$0xff] %v2167_v3 }
  0x1a   :  { %119 = vmatprep.subr.mxu0 %v2047_v44  ;;  %189 = vmatpush1.msra.mxu1 %v2101_v53 }
  0x1b   :  { %120 = vmatpush1.msra.mxu0 %v2059_v46  ;;  %190 = vmatprep.subr.mxu1 %v2113_v55 }
  0x1c   :  { %121 = vmatprep.subr.mxu0 %v2071_v48  ;;  %191 = vmatpush1.msra.mxu1 %v2125_v57 }
  0x1d   :  { %122 = vmatpush1.msra.mxu0 %v2083_v50  ;;  %192 = vmatprep.subr.mxu1 %v2137_v59 }
  0x1e   :  { %123 = vmatprep.subr.mxu0 %v2095_v52  ;;  %193 = vmatpush1.msra.mxu1 %v2147_v61 }
  0x1f   :  { %124 = vmatpush1.msra.mxu0 %v2107_v54  ;;  %194 = vmatprep.subr.mxu1 %v2154_v62 }
  0x20   :  { %125 = vmatprep.subr.mxu0 %v2119_v56  ;;  %195 = vmatpush1.msra.mxu1 %v2161_v63 }
  0x21   :  { %126 = vmatpush1.msra.mxu0 %v2131_v58  ;;  %v2173_v58 = vld [vmem:[%s3107_s3 + $0x10] sm:$0xff]  ;;  %196 = vmatprep.subr.mxu1 %v2167_v3 }
  0x22   :  { %160 = vmatmul.mubr.f32.vlgmr.msra.gmra.mxu0 %v21_v60  ;;  %3198 = vst [vmem:[#allocation21_spill] sm:$0xff] %v2173_v58  ;;  %271 = vmatprep.subr.mxu0 %v1792_v0 }
  0x23   :  { %272 = vmatpush1.msra.mxu0 %v1797_v1  ;;  %197 = vmatpush1.msra.mxu1 %v2173_v58 }
  0x24   :  { %273 = vmatprep.subr.mxu0 %v1802_v2  ;;  %231 = vmatmul.mubr.f32.vlgmr.msra.gmra.mxu1 %v21_v60  ;;  %v3199_v60 = vld [vmem:[#allocation15_spill] sm:$0xff] }
  0x25   :  { %274 = vmatpush1.msra.mxu0 %v1810_v4  ;;  %342 = vmatprep.subr.mxu1 %v1839_v9 }
  0x26   :  { %343 = vmatpush1.msra.mxu1 %v1851_v11  ;;  %275 = vmatprep.subr.mxu0 %v1816_v5 }
  0x27   :  { %344 = vmatprep.subr.mxu1 %v1863_v13  ;;  %276 = vmatpush1.msra.mxu0 %v1822_v6 }
  0x28   :  { %345 = vmatpush1.msra.mxu1 %v1868_v14  ;;  %277 = vmatprep.subr.mxu0 %v1828_v7 }
  0x29   :  { %346 = vmatprep.subr.mxu1 %v1880_v16  ;;  %278 = vmatpush1.msra.mxu0 %v1834_v8 }
  0x2a   :  { %347 = vmatpush1.msra.mxu1 %v1892_v18  ;;  %279 = vmatprep.subr.mxu0 %v1845_v10 }
  0x2b   :  { %348 = vmatprep.subr.mxu1 %v1897_v19  ;;  %280 = vmatpush1.msra.mxu0 %v1857_v12 }
  0x2c   :  { %349 = vmatpush1.msra.mxu1 %v1909_v21  ;;  %281 = vmatprep.subr.mxu0 %v1874_v15 }
  0x2d   :  { %350 = vmatprep.subr.mxu1 %v1921_v23  ;;  %282 = vmatpush1.msra.mxu0 %v1886_v17 }
  0x2e   :  { %351 = vmatpush1.msra.mxu1 %v1933_v25  ;;  %283 = vmatprep.subr.mxu0 %v1903_v20 }
  0x2f   :  { %352 = vmatprep.subr.mxu1 %v1945_v27  ;;  %284 = vmatpush1.msra.mxu0 %v1915_v22 }
  0x30   :  { %353 = vmatpush1.msra.mxu1 %v1957_v29  ;;  %285 = vmatprep.subr.mxu0 %v1927_v24 }
  0x31   :  { %354 = vmatprep.subr.mxu1 %v1969_v31  ;;  %286 = vmatpush1.msra.mxu0 %v1939_v26 }
  0x32   :  { %355 = vmatpush1.msra.mxu1 %v1981_v33  ;;  %287 = vmatprep.subr.mxu0 %v1951_v28 }
  0x33   :  { %356 = vmatprep.subr.mxu1 %v1993_v35  ;;  %288 = vmatpush1.msra.mxu0 %v1963_v30 }
  0x34   :  { %357 = vmatpush1.msra.mxu1 %v2005_v37  ;;  %289 = vmatprep.subr.mxu0 %v1975_v32 }
  0x35   :  { %358 = vmatprep.subr.mxu1 %v2017_v39  ;;  %290 = vmatpush1.msra.mxu0 %v1987_v34 }
  0x36   :  { %359 = vmatpush1.msra.mxu1 %v2029_v41  ;;  %291 = vmatprep.subr.mxu0 %v1999_v36 }
  0x37   :  { %360 = vmatprep.subr.mxu1 %v2041_v43  ;;  %292 = vmatpush1.msra.mxu0 %v2011_v38 }
  0x38   :  { %361 = vmatpush1.msra.mxu1 %v2053_v45  ;;  %293 = vmatprep.subr.mxu0 %v2023_v40 }
  0x39   :  { %362 = vmatprep.subr.mxu1 %v2065_v47  ;;  %294 = vmatpush1.msra.mxu0 %v2035_v42 }
  0x3a   :  { %363 = vmatpush1.msra.mxu1 %v2077_v49  ;;  %295 = vmatprep.subr.mxu0 %v2047_v44 }
  0x3b   :  { %364 = vmatprep.subr.mxu1 %v2089_v51  ;;  %296 = vmatpush1.msra.mxu0 %v2059_v46 }
  0x3c   :  { %365 = vmatpush1.msra.mxu1 %v2101_v53  ;;  %297 = vmatprep.subr.mxu0 %v2071_v48  ;;  %v3200_v48 = vmov 0.0  }
  0x3d   :  { %366 = vmatprep.subr.mxu1 %v2113_v55  ;;  %298 = vmatpush1.msra.mxu0 %v2083_v50 }
  0x3e   :  { %367 = vmatpush1.msra.mxu1 %v2125_v57  ;;  %299 = vmatprep.subr.mxu0 %v2095_v52 }
  0x3f   :  { %368 = vmatprep.subr.mxu1 %v2137_v59  ;;  %300 = vmatpush1.msra.mxu0 %v2107_v54 }
  0x40   :  { %369 = vmatpush1.msra.mxu1 %v2147_v61  ;;  %301 = vmatprep.subr.mxu0 %v2119_v56  ;;  %v91_v56 = vld [vmem:[%s3109_s0] sm:$0xff]  ;;  %v93_v61 = vld [vmem:[%s3109_s0 + $0x10] sm:$0xff] }
  0x41   :  { %370 = vmatprep.subr.mxu1 %v2154_v62  ;;  %302 = vmatpush1.msra.mxu0 %v3199_v60  ;;  %v92_v60 = vld [vmem:[%s3109_s0 + $0x8] sm:$0xff] }
  0x42   :  { %371 = vmatpush1.msra.mxu1 %v2161_v63  ;;  %335 = vmatprep.mubr.f32.mxu0 %v3200_v48 }
  0x43   :  { %372 = vmatprep.subr.mxu1 %v2167_v3  ;;  %406 = vmatprep.mubr.f32.mxu1 %v3200_v48 }
  0x44   :  { %373 = vmatpush1.msra.mxu1 %v2173_v58  ;;  %448 = vmatprep.subr.mxu0 %v1792_v0 }
  0x45   :  { %519 = vmatprep.subr.mxu1 %v1839_v9  ;;  %v94_v9 = vld [vmem:[%s3109_s0 + $0x18] sm:$0xff] }
  0xe2   :  { %v161_v54 = vpop.f32.mrf.mxu0 }
  0xe3   :  { %v237_v63 = vadd.f32 %v161_v54, %v91_v56 }
  0xe4   :  { %v163_v62 = vpop.f32.mrf.mxu0  ;;  %v232_v58 = vpop.f32.mrf.mxu1 }
  0xe5   :  { %v1511_v3 = vmul.f32 -1.442695, %v237_v63  ;;  %v238_v52 = vadd.f32 %v163_v62, %v92_v60  ;;  %v239_v59 = vadd.f32 %v232_v58, %v93_v61  ;;  %v23_v60 = vld [vmem:[%s3110_s2] sm:$0xff]  ;;  %v3203_v61 = vld [vmem:[#allocation14_spill] sm:$0xff] }
  0xe6   :  { %v234_v0 = vpop.f32.mrf.mxu1 }
  0xe7   :  { %1571 = vpow2.f32 %v1511_v3  ;;  %v1512_v48 = vmul.f32 -1.442695, %v238_v52  ;;  %v240_v50 = vadd.f32 %v234_v0, %v94_v9 }
  0xe9   :  { %1573 = vpow2.f32 %v1512_v48  ;;  %v1513_v57 = vmul.f32 -1.442695, %v240_v50 }
  0xea   :  { %1575 = vtanh.f32 %v239_v59 }
  0xeb   :  { %1577 = vpow2.f32 %v1513_v57 }
  0xf4   :  { %v1572_v54 = vpop.eup %1571 }
  0xf5   :  { %v244_v56 = vadd.f32 1.0, %v1572_v54  ;;  %v3204_v54 = vld [vmem:[#allocation8_spill] sm:$0xff] }
  0xf6   :  { %v1574_v62 = vpop.eup %1573 }
  0xf7   :  { %1579 = vrcp.f32 %v244_v56  ;;  %v250_v3 = vadd.f32 1.0, %v1574_v62  ;;  %v1576_v48 = vpop.eup %1575  ;;  %v3205_v56 = vld [vmem:[#allocation16_spill] sm:$0xff]  ;;  %v3206_v62 = vld [vmem:[#allocation9_spill] sm:$0xff] }
  0xf8   :  { %v1578_v52 = vpop.eup %1577 }
  0xf9   :  { %1581 = vrcp.f32 %v250_v3  ;;  %v257_v55 = vadd.f32 1.0, %v1578_v52  ;;  %v3207_v3 = vld [vmem:[#allocation17_spill] sm:$0xff]  ;;  %v3209_v52 = vld [vmem:[#allocation18_spill] sm:$0xff] }
  0xfb   :  { %1583 = vrcp.f32 %v257_v55  ;;  %v3202_v55 = vld [vmem:[#allocation7_spill] sm:$0xff] }
 0x104   :  { %v1580_v63 = vpop.eup %1579 }
 0x105   :  { %v261_v9 = vmul.f32 %v1580_v63, %v1576_v48  ;;  %v3208_v48 = vld [vmem:[#allocation10_spill] sm:$0xff]  ;;  %v3210_v63 = vld [vmem:[#allocation11_spill] sm:$0xff] }
 0x106   :  { %v1582_v46 = vpop.eup %1581 }
 0x107   :  { %v260_v0 = vmul.f32 %v1582_v46, %v23_v60  ;;  %v3201_v46 = vld [vmem:[#allocation12_spill] sm:$0xff]  ;;  %v3211_v60 = vld [vmem:[#allocation19_spill] sm:$0xff] }
 0x108   :  { %v1584_v57 = vpop.eup %1583 }
 0x109   :  { %v2261_v50 = vadd.f32 %v261_v9, %v260_v0  ;;  %v3212_v0 = vld [vmem:[#allocation13_spill] sm:$0xff]  ;;  %v3213_v9 = vld [vmem:[#allocation20_spill] sm:$0xff] }
 0x10b   :  { %1585 = vtanh.f32 %v2261_v50 }
 0x118   :  { %v1586_v58 = vpop.eup %1585 }
 0x119   :  { %v264_v59 = vmul.f32 %v1586_v58, %v1584_v57  ;;  %v3214_v57 = vld [vmem:[#allocation15_spill] sm:$0xff]  ;;  %v3215_v58 = vmov 0.0  }
 0x11b   :  { %265 = vst [vmem:[%s3111_s4] sm:$0xff] %v264_v59  ;;  %336 = vmatmul.mubr.f32.vlgmr.msra.gmra.mxu0 %v264_v59  ;;  %407 = vmatmul.mubr.f32.vlgmr.msra.gmra.mxu1 %v264_v59  ;;  %v3216_v59 = vld [vmem:[#allocation21_spill] sm:$0xff] }
 0x11c   :  { %449 = vmatpush1.msra.mxu0 %v1797_v1  ;;  %520 = vmatpush1.msra.mxu1 %v1851_v11 }
 0x11d   :  { %450 = vmatprep.subr.mxu0 %v1802_v2  ;;  %521 = vmatprep.subr.mxu1 %v1863_v13 }
 0x11e   :  { %451 = vmatpush1.msra.mxu0 %v1810_v4  ;;  %522 = vmatpush1.msra.mxu1 %v1868_v14 }
 0x11f   :  { %452 = vmatprep.subr.mxu0 %v1816_v5  ;;  %523 = vmatprep.subr.mxu1 %v1880_v16 }
 0x120   :  { %453 = vmatpush1.msra.mxu0 %v1822_v6  ;;  %524 = vmatpush1.msra.mxu1 %v1892_v18 }
 0x121   :  { %454 = vmatprep.subr.mxu0 %v1828_v7  ;;  %525 = vmatprep.subr.mxu1 %v1897_v19 }
 0x122   :  { %455 = vmatpush1.msra.mxu0 %v1834_v8  ;;  %526 = vmatpush1.msra.mxu1 %v1909_v21 }
 0x123   :  { %456 = vmatprep.subr.mxu0 %v1845_v10  ;;  %527 = vmatprep.subr.mxu1 %v1921_v23 }
 0x124   :  { %457 = vmatpush1.msra.mxu0 %v1857_v12  ;;  %528 = vmatpush1.msra.mxu1 %v1933_v25 }
 0x125   :  { %458 = vmatprep.subr.mxu0 %v1874_v15  ;;  %529 = vmatprep.subr.mxu1 %v1945_v27 }
 0x126   :  { %459 = vmatpush1.msra.mxu0 %v1886_v17  ;;  %530 = vmatpush1.msra.mxu1 %v1957_v29 }
 0x127   :  { %460 = vmatprep.subr.mxu0 %v1903_v20  ;;  %531 = vmatprep.subr.mxu1 %v1969_v31 }
 0x128   :  { %461 = vmatpush1.msra.mxu0 %v1915_v22  ;;  %532 = vmatpush1.msra.mxu1 %v1981_v33 }
 0x129   :  { %462 = vmatprep.subr.mxu0 %v1927_v24  ;;  %533 = vmatprep.subr.mxu1 %v1993_v35 }
 0x12a   :  { %463 = vmatpush1.msra.mxu0 %v1939_v26  ;;  %534 = vmatpush1.msra.mxu1 %v2005_v37 }
 0x12b   :  { %464 = vmatprep.subr.mxu0 %v1951_v28  ;;  %535 = vmatprep.subr.mxu1 %v2017_v39 }
 0x12c   :  { %465 = vmatpush1.msra.mxu0 %v1963_v30  ;;  %536 = vmatpush1.msra.mxu1 %v2029_v41 }
 0x12d   :  { %466 = vmatprep.subr.mxu0 %v1975_v32  ;;  %537 = vmatprep.subr.mxu1 %v2041_v43 }
 0x12e   :  { %467 = vmatpush1.msra.mxu0 %v1987_v34  ;;  %538 = vmatpush1.msra.mxu1 %v2053_v45 }
 0x12f   :  { %468 = vmatprep.subr.mxu0 %v1999_v36  ;;  %539 = vmatprep.subr.mxu1 %v2065_v47 }
 0x130   :  { %469 = vmatpush1.msra.mxu0 %v2011_v38  ;;  %540 = vmatpush1.msra.mxu1 %v2077_v49 }
 0x131   :  { %470 = vmatprep.subr.mxu0 %v2023_v40  ;;  %541 = vmatprep.subr.mxu1 %v2089_v51 }
 0x132   :  { %471 = vmatpush1.msra.mxu0 %v2035_v42  ;;  %542 = vmatpush1.msra.mxu1 %v2101_v53 }
 0x133   :  { %472 = vmatprep.subr.mxu0 %v2047_v44  ;;  %543 = vmatprep.subr.mxu1 %v3201_v46 }
 0x134   :  { %473 = vmatpush1.msra.mxu0 %v3202_v55  ;;  %544 = vmatpush1.msra.mxu1 %v3203_v61 }
 0x135   :  { %474 = vmatprep.subr.mxu0 %v3204_v54  ;;  %545 = vmatprep.subr.mxu1 %v3205_v56  ;;  %v1516_v54 = vld [vmem:[%s3109_s0 + $0x30] sm:$0xff] }
 0x136   :  { %475 = vmatpush1.msra.mxu0 %v3206_v62  ;;  %546 = vmatpush1.msra.mxu1 %v3207_v3  ;;  %v3217_v3 = vld [vmem:[#allocation4_spill] sm:$0xff] }
 0x137   :  { %476 = vmatprep.subr.mxu0 %v3208_v48  ;;  %547 = vmatprep.subr.mxu1 %v3209_v52  ;;  %v3218_v48 = vld [vmem:[#allocation5_spill] sm:$0xff] }
 0x138   :  { %477 = vmatpush1.msra.mxu0 %v3210_v63  ;;  %548 = vmatpush1.msra.mxu1 %v3211_v60  ;;  %v1514_v60 = vld [vmem:[%s3109_s0 + $0x20] sm:$0xff] }
 0x139   :  { %478 = vmatprep.subr.mxu0 %v3212_v0  ;;  %549 = vmatprep.subr.mxu1 %v3213_v9  ;;  %v1515_v9 = vld [vmem:[%s3109_s0 + $0x28] sm:$0xff] }
 0x13a   :  { %479 = vmatpush1.msra.mxu0 %v3214_v57  ;;  %512 = vmatprep.mubr.f32.mxu0 %v3215_v58 }
 0x13b   :  { %550 = vmatpush1.msra.mxu1 %v3216_v59  ;;  %583 = vmatprep.mubr.f32.mxu1 %v3215_v58 }
 0x13c   :  { %625 = vmatprep.subr.mxu0 %v3217_v3  ;;  %696 = vmatprep.subr.mxu1 %v3218_v48  ;;  %v1517_v48 = vld [vmem:[%s3109_s0 + $0x38] sm:$0xff] }
 0x1db   :  { %v337_v63 = vpop.f32.mrf.mxu0  ;;  %v408_v59 = vpop.f32.mrf.mxu1 }
 0x1dc   :  { %v413_v57 = vadd.f32 %v1514_v60, %v337_v63  ;;  %v415_v63 = vadd.f32 %v1516_v54, %v408_v59  ;;  %v3222_v59 = vld [vmem:[#allocation14_spill] sm:$0xff] }
 0x1dd   :  { %v339_v0 = vpop.f32.mrf.mxu0  ;;  %v410_v3 = vpop.f32.mrf.mxu1 }
 0x1de   :  { %v1518_v52 = vmul.f32 -1.442695, %v413_v57  ;;  %v414_v62 = vadd.f32 %v1515_v9, %v339_v0  ;;  %v416_v56 = vadd.f32 %v1517_v48, %v410_v3 }
 0x1e0   :  { %1587 = vpow2.f32 %v1518_v52  ;;  %v1519_v58 = vmul.f32 -1.442695, %v414_v62  ;;  %v1520_v61 = vmul.f32 -1.442695, %v416_v56  ;;  %v3221_v56 = vld [vmem:[#allocation7_spill] sm:$0xff] }
 0x1e2   :  { %1589 = vpow2.f32 %v1519_v58 }
 0x1e3   :  { %1591 = vpow2.f32 %v1520_v61 }
 0x1ed   :  { %v1588_v55 = vpop.eup %1587 }
 0x1ee   :  { %v420_v60 = vadd.f32 1.0, %v1588_v55 }
 0x1ef   :  { %v1590_v57 = vpop.eup %1589 }
 0x1f0   :  { %1593 = vrcp.f32 %v420_v60  ;;  %v426_v52 = vadd.f32 1.0, %v1590_v57  ;;  %v1592_v62 = vpop.eup %1591  ;;  %v3224_v60 = vld [vmem:[#allocation16_spill] sm:$0xff]  ;;  %v3225_v57 = vld [vmem:[#allocation9_spill] sm:$0xff] }
 0x1f1   :  { %1595 = vtanh.f32 %v415_v63  ;;  %v433_v46 = vadd.f32 1.0, %v1592_v62  ;;  %v3223_v63 = vld [vmem:[#allocation8_spill] sm:$0xff]  ;;  %v3227_v62 = vld [vmem:[#allocation10_spill] sm:$0xff] }
 0x1f2   :  { %1597 = vrcp.f32 %v426_v52  ;;  %v3226_v52 = vld [vmem:[#allocation17_spill] sm:$0xff] }
 0x1f3   :  { %1599 = vrcp.f32 %v433_v46  ;;  %v3220_v46 = vld [vmem:[#allocation12_spill] sm:$0xff] }
 0x1fd   :  { %v1594_v0 = vpop.eup %1593 }
 0x1fe   :  { %v1596_v9 = vpop.eup %1595 }
 0x1ff   :  { %v1598_v58 = vpop.eup %1597  ;;  %v437_v3 = vmul.f32 %v1596_v9, %v1594_v0  ;;  %v3228_v0 = vld [vmem:[#allocation18_spill] sm:$0xff]  ;;  %v3229_v9 = vld [vmem:[#allocation11_spill] sm:$0xff] }
 0x200   :  { %v436_v48 = vmul.f32 %v1598_v58, %v2261_v50  ;;  %v1600_v55 = vpop.eup %1599  ;;  %v3219_v50 = vld [vmem:[#allocation6_spill] sm:$0xff]  ;;  %v3230_v58 = vld [vmem:[#allocation19_spill] sm:$0xff] }
 0x202   :  { %v2346_v44 = vadd.f32 %v437_v3, %v436_v48  ;;  %v3231_v3 = vld [vmem:[#allocation13_spill] sm:$0xff]  ;;  %v3232_v48 = vld [vmem:[#allocation20_spill] sm:$0xff] }
 0x204   :  { %1601 = vtanh.f32 %v2346_v44 }
 0x211   :  { %v1602_v54 = vpop.eup %1601 }
 0x212   :  { %v440_v61 = vmul.f32 %v1602_v54, %v1600_v55  ;;  %v3233_v55 = vld [vmem:[#allocation15_spill] sm:$0xff]  ;;  %v3234_v54 = vmov 0.0  }
 0x214   :  { %1521 = vst [vmem:[%s3111_s4 + $0x8] sm:$0xff] %v440_v61  ;;  %513 = vmatmul.mubr.f32.vlgmr.msra.gmra.mxu0 %v440_v61  ;;  %584 = vmatmul.mubr.f32.vlgmr.msra.gmra.mxu1 %v440_v61  ;;  %v3235_v61 = vld [vmem:[#allocation21_spill] sm:$0xff] }
 0x215   :  { %626 = vmatpush1.msra.mxu0 %v1797_v1  ;;  %697 = vmatpush1.msra.mxu1 %v1851_v11 }
 0x216   :  { %627 = vmatprep.subr.mxu0 %v1802_v2  ;;  %698 = vmatprep.subr.mxu1 %v1863_v13 }
 0x217   :  { %628 = vmatpush1.msra.mxu0 %v1810_v4  ;;  %699 = vmatpush1.msra.mxu1 %v1868_v14 }
 0x218   :  { %629 = vmatprep.subr.mxu0 %v1816_v5  ;;  %700 = vmatprep.subr.mxu1 %v1880_v16 }
 0x219   :  { %630 = vmatpush1.msra.mxu0 %v1822_v6  ;;  %701 = vmatpush1.msra.mxu1 %v1892_v18 }
 0x21a   :  { %631 = vmatprep.subr.mxu0 %v1828_v7  ;;  %702 = vmatprep.subr.mxu1 %v1897_v19 }
 0x21b   :  { %632 = vmatpush1.msra.mxu0 %v1834_v8  ;;  %703 = vmatpush1.msra.mxu1 %v1909_v21 }
 0x21c   :  { %633 = vmatprep.subr.mxu0 %v1845_v10  ;;  %704 = vmatprep.subr.mxu1 %v1921_v23 }
 0x21d   :  { %634 = vmatpush1.msra.mxu0 %v1857_v12  ;;  %705 = vmatpush1.msra.mxu1 %v1933_v25 }
 0x21e   :  { %635 = vmatprep.subr.mxu0 %v1874_v15  ;;  %706 = vmatprep.subr.mxu1 %v1945_v27 }
 0x21f   :  { %636 = vmatpush1.msra.mxu0 %v1886_v17  ;;  %707 = vmatpush1.msra.mxu1 %v1957_v29 }
 0x220   :  { %637 = vmatprep.subr.mxu0 %v1903_v20  ;;  %708 = vmatprep.subr.mxu1 %v1969_v31 }
 0x221   :  { %638 = vmatpush1.msra.mxu0 %v1915_v22  ;;  %709 = vmatpush1.msra.mxu1 %v1981_v33 }
 0x222   :  { %639 = vmatprep.subr.mxu0 %v1927_v24  ;;  %710 = vmatprep.subr.mxu1 %v1993_v35 }
 0x223   :  { %640 = vmatpush1.msra.mxu0 %v1939_v26  ;;  %711 = vmatpush1.msra.mxu1 %v2005_v37 }
 0x224   :  { %641 = vmatprep.subr.mxu0 %v1951_v28  ;;  %712 = vmatprep.subr.mxu1 %v2017_v39 }
 0x225   :  { %642 = vmatpush1.msra.mxu0 %v1963_v30  ;;  %713 = vmatpush1.msra.mxu1 %v2029_v41 }
 0x226   :  { %643 = vmatprep.subr.mxu0 %v1975_v32  ;;  %714 = vmatprep.subr.mxu1 %v2041_v43 }
 0x227   :  { %644 = vmatpush1.msra.mxu0 %v1987_v34  ;;  %715 = vmatpush1.msra.mxu1 %v2053_v45 }
 0x228   :  { %645 = vmatprep.subr.mxu0 %v1999_v36  ;;  %716 = vmatprep.subr.mxu1 %v2065_v47 }
 0x229   :  { %646 = vmatpush1.msra.mxu0 %v2011_v38  ;;  %717 = vmatpush1.msra.mxu1 %v2077_v49 }
 0x22a   :  { %647 = vmatprep.subr.mxu0 %v2023_v40  ;;  %718 = vmatprep.subr.mxu1 %v2089_v51 }
 0x22b   :  { %648 = vmatpush1.msra.mxu0 %v2035_v42  ;;  %719 = vmatpush1.msra.mxu1 %v2101_v53 }
 0x22c   :  { %649 = vmatprep.subr.mxu0 %v3219_v50  ;;  %720 = vmatprep.subr.mxu1 %v3220_v46 }
 0x22d   :  { %650 = vmatpush1.msra.mxu0 %v3221_v56  ;;  %721 = vmatpush1.msra.mxu1 %v3222_v59 }
 0x22e   :  { %651 = vmatprep.subr.mxu0 %v3223_v63  ;;  %722 = vmatprep.subr.mxu1 %v3224_v60  ;;  %v1524_v63 = vld [vmem:[%s3109_s0 + $0x50] sm:$0xff] }
 0x22f   :  { %652 = vmatpush1.msra.mxu0 %v3225_v57  ;;  %723 = vmatpush1.msra.mxu1 %v3226_v52  ;;  %v3236_v52 = vld [vmem:[#allocation4_spill] sm:$0xff] }
 0x230   :  { %653 = vmatprep.subr.mxu0 %v3227_v62  ;;  %724 = vmatprep.subr.mxu1 %v3228_v0  ;;  %v3237_v62 = vld [vmem:[#allocation5_spill] sm:$0xff] }
 0x231   :  { %654 = vmatpush1.msra.mxu0 %v3229_v9  ;;  %725 = vmatpush1.msra.mxu1 %v3230_v58  ;;  %v1522_v58 = vld [vmem:[%s3109_s0 + $0x40] sm:$0xff] }
 0x232   :  { %655 = vmatprep.subr.mxu0 %v3231_v3  ;;  %726 = vmatprep.subr.mxu1 %v3232_v48  ;;  %v1523_v48 = vld [vmem:[%s3109_s0 + $0x48] sm:$0xff] }
 0x233   :  { %656 = vmatpush1.msra.mxu0 %v3233_v55  ;;  %689 = vmatprep.mubr.f32.mxu0 %v3234_v54 }
 0x234   :  { %727 = vmatpush1.msra.mxu1 %v3235_v61  ;;  %760 = vmatprep.mubr.f32.mxu1 %v3234_v54 }
 0x235   :  { %802 = vmatprep.subr.mxu0 %v3236_v52  ;;  %873 = vmatprep.subr.mxu1 %v3237_v62  ;;  %v1525_v52 = vld [vmem:[%s3109_s0 + $0x58] sm:$0xff] }
 0x2d4   :  { %v514_v9 = vpop.f32.mrf.mxu0  ;;  %v585_v61 = vpop.f32.mrf.mxu1 }
 0x2d5   :  { %v590_v55 = vadd.f32 %v1522_v58, %v514_v9  ;;  %v592_v9 = vadd.f32 %v1524_v63, %v585_v61  ;;  %v2530_v61 = vld [vmem:[%s3107_s3 + $0x1e0] sm:$0xff] }
 0x2d6   :  { %v516_v3 = vpop.f32.mrf.mxu0  ;;  %v587_v62 = vpop.f32.mrf.mxu1 }
 0x2d7   :  { %v1526_v0 = vmul.f32 -1.442695, %v590_v55  ;;  %v591_v57 = vadd.f32 %v1523_v48, %v516_v3  ;;  %v593_v60 = vadd.f32 %v1525_v52, %v587_v62 }
 0x2d9   :  { %1603 = vpow2.f32 %v1526_v0  ;;  %v1527_v54 = vmul.f32 -1.442695, %v591_v57  ;;  %v1528_v59 = vmul.f32 -1.442695, %v593_v60 }
 0x2db   :  { %1605 = vpow2.f32 %v1527_v54 }
 0x2dc   :  { %1607 = vpow2.f32 %v1528_v59 }
 0x2e6   :  { %v1604_v56 = vpop.eup %1603 }
 0x2e7   :  { %v597_v58 = vadd.f32 1.0, %v1604_v56 }
 0x2e8   :  { %v1606_v55 = vpop.eup %1605 }
 0x2e9   :  { %1609 = vrcp.f32 %v597_v58  ;;  %v603_v0 = vadd.f32 1.0, %v1606_v55  ;;  %v1608_v57 = vpop.eup %1607  ;;  %v2548_v58 = vld [vmem:[%s3107_s3 + $0x1d8] sm:$0xff]  ;;  %v2554_v55 = vld [vmem:[%s3107_s3 + $0x1c0] sm:$0xff] }
 0x2ea   :  { %1611 = vtanh.f32 %v592_v9  ;;  %v610_v46 = vadd.f32 1.0, %v1608_v57  ;;  %v2542_v9 = vld [vmem:[%s3107_s3 + $0x1c8] sm:$0xff] }
 0x2eb   :  { %1613 = vrcp.f32 %v603_v0  ;;  %v2560_v0 = vld [vmem:[%s3107_s3 + $0x1d0] sm:$0xff]  ;;  %v2566_v57 = vld [vmem:[%s3107_s3 + $0x1a8] sm:$0xff] }
 0x2ec   :  { %1615 = vrcp.f32 %v610_v46 }
 0x2f6   :  { %v1610_v3 = vpop.eup %1609 }
 0x2f7   :  { %v1612_v48 = vpop.eup %1611 }
 0x2f8   :  { %v1614_v54 = vpop.eup %1613  ;;  %v614_v62 = vmul.f32 %v1612_v48, %v1610_v3  ;;  %v2572_v3 = vld [vmem:[%s3107_s3 + $0x1b8] sm:$0xff]  ;;  %v2578_v48 = vld [vmem:[%s3107_s3 + $0x1a0] sm:$0xff] }
 0x2f9   :  { %v613_v52 = vmul.f32 %v1614_v54, %v2346_v44  ;;  %v1616_v56 = vpop.eup %1615  ;;  %v2584_v54 = vld [vmem:[%s3107_s3 + $0x1b0] sm:$0xff] }
 0x2fb   :  { %v2431_v50 = vadd.f32 %v614_v62, %v613_v52  ;;  %v2590_v62 = vld [vmem:[%s3107_s3 + $0x188] sm:$0xff]  ;;  %v2596_v52 = vld [vmem:[%s3107_s3 + $0x198] sm:$0xff] }
 0x2fd   :  { %1617 = vtanh.f32 %v2431_v50 }
 0x30a   :  { %v1618_v63 = vpop.eup %1617 }
 0x30b   :  { %v617_v59 = vmul.f32 %v1618_v63, %v1616_v56  ;;  %v2602_v56 = vld [vmem:[%s3107_s3 + $0x180] sm:$0xff]  ;;  %v2608_v63 = vld [vmem:[%s3107_s3 + $0x190] sm:$0xff] }
 0x30d   :  { %1529 = vst [vmem:[%s3111_s4 + $0x10] sm:$0xff] %v617_v59  ;;  %690 = vmatmul.mubr.f32.vlgmr.msra.gmra.mxu0 %v617_v59  ;;  %761 = vmatmul.mubr.f32.vlgmr.msra.gmra.mxu1 %v617_v59  ;;  %v2614_v59 = vld [vmem:[%s3107_s3 + $0x168] sm:$0xff] }
 0x30e   :  { %803 = vmatpush1.msra.mxu0 %v1797_v1  ;;  %874 = vmatpush1.msra.mxu1 %v1851_v11  ;;  %v3238_v1 = vld [vmem:[#allocation6_spill] sm:$0xff] }
 0x30f   :  { %804 = vmatprep.subr.mxu0 %v1802_v2  ;;  %875 = vmatprep.subr.mxu1 %v1863_v13  ;;  %v3239_v2 = vld [vmem:[#allocation12_spill] sm:$0xff]  ;;  %v3246_v11 = vld [vmem:[#allocation10_spill] sm:$0xff]  ;;  %v3248_v13 = vld [vmem:[#allocation11_spill] sm:$0xff] }
 0x310   :  { %805 = vmatpush1.msra.mxu0 %v1810_v4  ;;  %876 = vmatpush1.msra.mxu1 %v1868_v14  ;;  %v3240_v4 = vld [vmem:[#allocation7_spill] sm:$0xff] }
 0x311   :  { %806 = vmatprep.subr.mxu0 %v1816_v5  ;;  %877 = vmatprep.subr.mxu1 %v1880_v16  ;;  %v3241_v5 = vld [vmem:[#allocation14_spill] sm:$0xff]  ;;  %v3249_v14 = vld [vmem:[#allocation19_spill] sm:$0xff]  ;;  %v3251_v16 = vld [vmem:[#allocation20_spill] sm:$0xff] }
 0x312   :  { %807 = vmatpush1.msra.mxu0 %v1822_v6  ;;  %878 = vmatpush1.msra.mxu1 %v1892_v18  ;;  %v3242_v6 = vld [vmem:[#allocation8_spill] sm:$0xff]  ;;  %v3253_v18 = vmov 0.0  }
 0x313   :  { %808 = vmatprep.subr.mxu0 %v1828_v7  ;;  %879 = vmatprep.subr.mxu1 %v1897_v19  ;;  %v3243_v7 = vld [vmem:[#allocation16_spill] sm:$0xff]  ;;  %v3254_v19 = vld [vmem:[#allocation21_spill] sm:$0xff] }
 0x314   :  { %809 = vmatpush1.msra.mxu0 %v1834_v8  ;;  %880 = vmatpush1.msra.mxu1 %v1909_v21  ;;  %v3244_v8 = vld [vmem:[#allocation9_spill] sm:$0xff] }
 0x315   :  { %810 = vmatprep.subr.mxu0 %v1845_v10  ;;  %881 = vmatprep.subr.mxu1 %v1921_v23  ;;  %v3245_v10 = vld [vmem:[#allocation17_spill] sm:$0xff] }
 0x316   :  { %811 = vmatpush1.msra.mxu0 %v1857_v12  ;;  %882 = vmatpush1.msra.mxu1 %v1933_v25  ;;  %v3247_v12 = vld [vmem:[#allocation18_spill] sm:$0xff]  ;;  %v3256_v21 = vld [vmem:[#allocation5_spill] sm:$0xff] }
 0x317   :  { %812 = vmatprep.subr.mxu0 %v1874_v15  ;;  %883 = vmatprep.subr.mxu1 %v1945_v27  ;;  %v3250_v15 = vld [vmem:[#allocation13_spill] sm:$0xff] }
 0x318   :  { %813 = vmatpush1.msra.mxu0 %v1886_v17  ;;  %884 = vmatpush1.msra.mxu1 %v1957_v29  ;;  %v3252_v17 = vld [vmem:[#allocation15_spill] sm:$0xff] }
 0x319   :  { %814 = vmatprep.subr.mxu0 %v1903_v20  ;;  %885 = vmatprep.subr.mxu1 %v1969_v31  ;;  %v2504_v20 = vld [vmem:[%s3107_s3 + $0x1e8] sm:$0xff]  ;;  %v1533_v31 = vld [vmem:[%s3109_s0 + $0x78] sm:$0xff] }
 0x31a   :  { %815 = vmatpush1.msra.mxu0 %v1915_v22  ;;  %886 = vmatpush1.msra.mxu1 %v1981_v33  ;;  %3255 = vst [vmem:[#allocation4_spill] sm:$0xff] %v2504_v20  ;;  %v1530_v22 = vld [vmem:[%s3109_s0 + $0x60] sm:$0xff] }
 0x31b   :  { %816 = vmatprep.subr.mxu0 %v1927_v24  ;;  %887 = vmatprep.subr.mxu1 %v1993_v35  ;;  %v1531_v24 = vld [vmem:[%s3109_s0 + $0x68] sm:$0xff] }
 0x31c   :  { %817 = vmatpush1.msra.mxu0 %v1939_v26  ;;  %888 = vmatpush1.msra.mxu1 %v2005_v37 }
 0x31d   :  { %818 = vmatprep.subr.mxu0 %v1951_v28  ;;  %889 = vmatprep.subr.mxu1 %v2017_v39 }
 0x31e   :  { %819 = vmatpush1.msra.mxu0 %v1963_v30  ;;  %890 = vmatpush1.msra.mxu1 %v2029_v41 }
 0x31f   :  { %820 = vmatprep.subr.mxu0 %v1975_v32  ;;  %891 = vmatprep.subr.mxu1 %v2041_v43 }
 0x320   :  { %821 = vmatpush1.msra.mxu0 %v1987_v34  ;;  %892 = vmatpush1.msra.mxu1 %v2053_v45  ;;  %v1532_v34 = vld [vmem:[%s3109_s0 + $0x70] sm:$0xff] }
 0x321   :  { %822 = vmatprep.subr.mxu0 %v1999_v36  ;;  %893 = vmatprep.subr.mxu1 %v2065_v47 }
 0x322   :  { %823 = vmatpush1.msra.mxu0 %v2011_v38  ;;  %894 = vmatpush1.msra.mxu1 %v2077_v49 }
 0x323   :  { %824 = vmatprep.subr.mxu0 %v2023_v40  ;;  %895 = vmatprep.subr.mxu1 %v2089_v51 }
 0x324   :  { %825 = vmatpush1.msra.mxu0 %v2035_v42  ;;  %896 = vmatpush1.msra.mxu1 %v2101_v53 }
 0x325   :  { %826 = vmatprep.subr.mxu0 %v3238_v1  ;;  %897 = vmatprep.subr.mxu1 %v3239_v2  ;;  %v2620_v1 = vld [vmem:[%s3107_s3 + $0x178] sm:$0xff] }
 0x326   :  { %827 = vmatpush1.msra.mxu0 %v3240_v4  ;;  %898 = vmatpush1.msra.mxu1 %v3241_v5  ;;  %v2626_v4 = vld [vmem:[%s3107_s3 + $0x160] sm:$0xff] }
 0x327   :  { %828 = vmatprep.subr.mxu0 %v3242_v6  ;;  %899 = vmatprep.subr.mxu1 %v3243_v7  ;;  %v2632_v6 = vld [vmem:[%s3107_s3 + $0x170] sm:$0xff] }
 0x328   :  { %829 = vmatpush1.msra.mxu0 %v3244_v8  ;;  %900 = vmatpush1.msra.mxu1 %v3245_v10  ;;  %v2638_v8 = vld [vmem:[%s3107_s3 + $0x148] sm:$0xff] }
 0x329   :  { %830 = vmatprep.subr.mxu0 %v3246_v11  ;;  %901 = vmatprep.subr.mxu1 %v3247_v12  ;;  %v2644_v11 = vld [vmem:[%s3107_s3 + $0x158] sm:$0xff] }
 0x32a   :  { %831 = vmatpush1.msra.mxu0 %v3248_v13  ;;  %902 = vmatpush1.msra.mxu1 %v3249_v14  ;;  %v2650_v13 = vld [vmem:[%s3107_s3 + $0x140] sm:$0xff] }
 0x32b   :  { %832 = vmatprep.subr.mxu0 %v3250_v15  ;;  %903 = vmatprep.subr.mxu1 %v3251_v16  ;;  %v2656_v15 = vld [vmem:[%s3107_s3 + $0x150] sm:$0xff] }
 0x32c   :  { %833 = vmatpush1.msra.mxu0 %v3252_v17  ;;  %866 = vmatprep.mubr.f32.mxu0 %v3253_v18  ;;  %v2662_v17 = vld [vmem:[%s3107_s3 + $0x128] sm:$0xff] }
 0x32d   :  { %904 = vmatpush1.msra.mxu1 %v3254_v19  ;;  %937 = vmatprep.mubr.f32.mxu1 %v3253_v18 }
 0x32e   :  { %979 = vmatprep.subr.mxu0 %v2504_v20  ;;  %1050 = vmatprep.subr.mxu1 %v3256_v21  ;;  %v2668_v21 = vld [vmem:[%s3107_s3 + $0x138] sm:$0xff] }
 0x3cd   :  { %v691_v23 = vpop.f32.mrf.mxu0  ;;  %v762_v29 = vpop.f32.mrf.mxu1 }
 0x3ce   :  { %v767_v25 = vadd.f32 %v1530_v22, %v691_v23  ;;  %v769_v37 = vadd.f32 %v1532_v34, %v762_v29  ;;  %v2674_v22 = vld [vmem:[%s3107_s3 + $0x120] sm:$0xff]  ;;  %v2680_v23 = vld [vmem:[%s3107_s3 + $0x130] sm:$0xff]  ;;  %v2716_v29 = vld [vmem:[%s3107_s3 + $0xf8] sm:$0xff] }
 0x3cf   :  { %v693_v26 = vpop.f32.mrf.mxu0  ;;  %v764_v32 = vpop.f32.mrf.mxu1  ;;  %v2746_v34 = vld [vmem:[%s3107_s3 + $0xc0] sm:$0xff] }
 0x3d0   :  { %v1534_v27 = vmul.f32 -1.442695, %v767_v25  ;;  %v768_v28 = vadd.f32 %v1531_v24, %v693_v26  ;;  %v770_v33 = vadd.f32 %v1533_v31, %v764_v32  ;;  %v2686_v24 = vld [vmem:[%s3107_s3 + $0x108] sm:$0xff]  ;;  %v2692_v25 = vld [vmem:[%s3107_s3 + $0x118] sm:$0xff]  ;;  %v2698_v26 = vld [vmem:[%s3107_s3 + $0x100] sm:$0xff] }
 0x3d1   :  { %v2728_v31 = vld [vmem:[%s3107_s3 + $0xf0] sm:$0xff]  ;;  %v2734_v32 = vld [vmem:[%s3107_s3 + $0xc8] sm:$0xff] }
 0x3d2   :  { %1619 = vpow2.f32 %v1534_v27  ;;  %v1535_v30 = vmul.f32 -1.442695, %v768_v28  ;;  %v1536_v35 = vmul.f32 -1.442695, %v770_v33  ;;  %v2704_v27 = vld [vmem:[%s3107_s3 + $0x110] sm:$0xff]  ;;  %v2710_v28 = vld [vmem:[%s3107_s3 + $0xe8] sm:$0xff] }
 0x3d3   :  { %v2740_v33 = vld [vmem:[%s3107_s3 + $0xd8] sm:$0xff] }
 0x3d4   :  { %1621 = vpow2.f32 %v1535_v30  ;;  %v2722_v30 = vld [vmem:[%s3107_s3 + $0xe0] sm:$0xff] }
 0x3d5   :  { %1623 = vpow2.f32 %v1536_v35  ;;  %v2752_v35 = vld [vmem:[%s3107_s3 + $0xd0] sm:$0xff] }
 0x3df   :  { %v1620_v36 = vpop.eup %1619 }
 0x3e0   :  { %v774_v38 = vadd.f32 1.0, %v1620_v36  ;;  %v2758_v36 = vld [vmem:[%s3107_s3 + $0xa8] sm:$0xff] }
 0x3e1   :  { %v1622_v39 = vpop.eup %1621 }
 0x3e2   :  { %1625 = vrcp.f32 %v774_v38  ;;  %v780_v40 = vadd.f32 1.0, %v1622_v39  ;;  %v1624_v41 = vpop.eup %1623  ;;  %v2770_v38 = vld [vmem:[%s3107_s3 + $0xa0] sm:$0xff]  ;;  %v2776_v39 = vld [vmem:[%s3107_s3 + $0xb0] sm:$0xff] }
 0x3e3   :  { %1627 = vtanh.f32 %v769_v37  ;;  %v787_v45 = vadd.f32 1.0, %v1624_v41  ;;  %v2764_v37 = vld [vmem:[%s3107_s3 + $0xb8] sm:$0xff] }
 0x3e4   :  { %1629 = vrcp.f32 %v780_v40  ;;  %v2782_v40 = vld [vmem:[%s3107_s3 + $0x88] sm:$0xff]  ;;  %v2788_v41 = vld [vmem:[%s3107_s3 + $0x98] sm:$0xff] }
 0x3e5   :  { %1631 = vrcp.f32 %v787_v45  ;;  %v2813_v45 = vld [vmem:[%s3107_s3 + $0x60] sm:$0xff] }
 0x3e6   :  { %3258 = vst [vmem:[#allocation12_spill] sm:$0xff] %v2813_v45 }
 0x3ef   :  { %v1626_v42 = vpop.eup %1625 }
 0x3f0   :  { %v1628_v43 = vpop.eup %1627 }
 0x3f1   :  { %v1630_v44 = vpop.eup %1629  ;;  %v791_v47 = vmul.f32 %v1628_v43, %v1626_v42  ;;  %v2794_v42 = vld [vmem:[%s3107_s3 + $0x80] sm:$0xff]  ;;  %v2800_v43 = vld [vmem:[%s3107_s3 + $0x90] sm:$0xff] }
 0x3f2   :  { %v790_v49 = vmul.f32 %v1630_v44, %v2431_v50  ;;  %v1632_v53 = vpop.eup %1631  ;;  %v2536_v50 = vld [vmem:[%s3107_s3 + $0x1f0] sm:$0xff]  ;;  %v2806_v44 = vld [vmem:[%s3107_s3 + $0x68] sm:$0xff] }
 0x3f3   :  { %3257 = vst [vmem:[#allocation6_spill] sm:$0xff] %v2806_v44 }
 0x3f4   :  { %v2521_v51 = vadd.f32 %v791_v47, %v790_v49  ;;  %v2820_v47 = vld [vmem:[%s3107_s3 + $0x48] sm:$0xff] }
 0x3f5   :  { %3259 = vst [vmem:[#allocation7_spill] sm:$0xff] %v2820_v47 }
 0x3f6   :  { %1633 = vtanh.f32 %v2521_v51 }
 0x403   :  { %v1634_v46 = vpop.eup %1633 }
 0x404   :  { %v794_v60 = vmul.f32 %v1634_v46, %v1632_v53 }
 0x406   :  { %1537 = vst [vmem:[%s3111_s4 + $0x18] sm:$0xff] %v794_v60  ;;  %867 = vmatmul.mubr.f32.vlgmr.msra.gmra.mxu0 %v794_v60  ;;  %938 = vmatmul.mubr.f32.vlgmr.msra.gmra.mxu1 %v794_v60 }
 0x407   :  { %980 = vmatpush1.msra.mxu0 %v2530_v61  ;;  %1051 = vmatpush1.msra.mxu1 %v2536_v50 }
 0x408   :  { %981 = vmatprep.subr.mxu0 %v2542_v9  ;;  %1052 = vmatprep.subr.mxu1 %v2548_v58 }
 0x409   :  { %982 = vmatpush1.msra.mxu0 %v2554_v55  ;;  %1053 = vmatpush1.msra.mxu1 %v2560_v0 }
 0x40a   :  { %983 = vmatprep.subr.mxu0 %v2566_v57  ;;  %1054 = vmatprep.subr.mxu1 %v2572_v3 }
 0x40b   :  { %984 = vmatpush1.msra.mxu0 %v2578_v48  ;;  %1055 = vmatpush1.msra.mxu1 %v2584_v54 }
 0x40c   :  { %985 = vmatprep.subr.mxu0 %v2590_v62  ;;  %1056 = vmatprep.subr.mxu1 %v2596_v52 }
 0x40d   :  { %986 = vmatpush1.msra.mxu0 %v2602_v56  ;;  %1057 = vmatpush1.msra.mxu1 %v2608_v63 }
 0x40e   :  { %987 = vmatprep.subr.mxu0 %v2614_v59  ;;  %1058 = vmatprep.subr.mxu1 %v2620_v1 }
 0x40f   :  { %988 = vmatpush1.msra.mxu0 %v2626_v4  ;;  %1059 = vmatpush1.msra.mxu1 %v2632_v6 }
 0x410   :  { %989 = vmatprep.subr.mxu0 %v2638_v8  ;;  %1060 = vmatprep.subr.mxu1 %v2644_v11 }
 0x411   :  { %990 = vmatpush1.msra.mxu0 %v2650_v13  ;;  %1061 = vmatpush1.msra.mxu1 %v2656_v15 }
 0x412   :  { %991 = vmatprep.subr.mxu0 %v2662_v17  ;;  %1062 = vmatprep.subr.mxu1 %v2668_v21 }
 0x413   :  { %992 = vmatpush1.msra.mxu0 %v2674_v22  ;;  %1063 = vmatpush1.msra.mxu1 %v2680_v23 }
 0x414   :  { %993 = vmatprep.subr.mxu0 %v2686_v24  ;;  %1064 = vmatprep.subr.mxu1 %v2692_v25 }
 0x415   :  { %994 = vmatpush1.msra.mxu0 %v2698_v26  ;;  %1065 = vmatpush1.msra.mxu1 %v2704_v27 }
 0x416   :  { %995 = vmatprep.subr.mxu0 %v2710_v28  ;;  %1066 = vmatprep.subr.mxu1 %v2716_v29 }
 0x417   :  { %996 = vmatpush1.msra.mxu0 %v2722_v30  ;;  %1067 = vmatpush1.msra.mxu1 %v2728_v31 }
 0x418   :  { %997 = vmatprep.subr.mxu0 %v2734_v32  ;;  %1068 = vmatprep.subr.mxu1 %v2740_v33 }
 0x419   :  { %998 = vmatpush1.msra.mxu0 %v2746_v34  ;;  %1069 = vmatpush1.msra.mxu1 %v2752_v35 }
 0x41a   :  { %999 = vmatprep.subr.mxu0 %v2758_v36  ;;  %1070 = vmatprep.subr.mxu1 %v2764_v37 }
 0x41b   :  { %1000 = vmatpush1.msra.mxu0 %v2770_v38  ;;  %1071 = vmatpush1.msra.mxu1 %v2776_v39 }
 0x41c   :  { %1001 = vmatprep.subr.mxu0 %v2782_v40  ;;  %1072 = vmatprep.subr.mxu1 %v2788_v41 }
 0x41d   :  { %1002 = vmatpush1.msra.mxu0 %v2794_v42  ;;  %1073 = vmatpush1.msra.mxu1 %v2800_v43 }
 0x41e   :  { %1003 = vmatprep.subr.mxu0 %v2806_v44  ;;  %1074 = vmatprep.subr.mxu1 %v3239_v2  ;;  %v2827_v2 = vld [vmem:[%s3107_s3 + $0x40] sm:$0xff] }
 0x41f   :  { %1004 = vmatpush1.msra.mxu0 %v2813_v45  ;;  %1075 = vmatpush1.msra.mxu1 %v3241_v5  ;;  %3260 = vst [vmem:[#allocation14_spill] sm:$0xff] %v2827_v2  ;;  %v2834_v5 = vld [vmem:[%s3107_s3 + $0x28] sm:$0xff] }
 0x420   :  { %1005 = vmatprep.subr.mxu0 %v2820_v47  ;;  %1076 = vmatprep.subr.mxu1 %v3243_v7  ;;  %3261 = vst [vmem:[#allocation8_spill] sm:$0xff] %v2834_v5  ;;  %v2841_v7 = vld [vmem:[%s3107_s3 + $0x20] sm:$0xff] }
 0x421   :  { %1006 = vmatpush1.msra.mxu0 %v2827_v2  ;;  %1077 = vmatpush1.msra.mxu1 %v3245_v10  ;;  %3262 = vst [vmem:[#allocation16_spill] sm:$0xff] %v2841_v7  ;;  %v2848_v10 = vld [vmem:[%s3107_s3 + $0x8] sm:$0xff] }
 0x422   :  { %1007 = vmatprep.subr.mxu0 %v2834_v5  ;;  %1078 = vmatprep.subr.mxu1 %v3247_v12  ;;  %3263 = vst [vmem:[#allocation9_spill] sm:$0xff] %v2848_v10  ;;  %v2855_v12 = vld [vmem:[%s3107_s3] sm:$0xff]  ;;  %v1540_v5 = vld [vmem:[%s3109_s0 + $0x90] sm:$0xff] }
 0x423   :  { %1008 = vmatpush1.msra.mxu0 %v2841_v7  ;;  %1079 = vmatpush1.msra.mxu1 %v3249_v14  ;;  %3264 = vst [vmem:[#allocation17_spill] sm:$0xff] %v2855_v12  ;;  %v2865_v14 = vld [vmem:[%s3107_s3 + $0x1f8] sm:$0xff] }
 0x424   :  { %1009 = vmatprep.subr.mxu0 %v2848_v10  ;;  %1080 = vmatprep.subr.mxu1 %v3251_v16  ;;  %3265 = vst [vmem:[#allocation10_spill] sm:$0xff] %v2865_v14  ;;  %v1538_v16 = vld [vmem:[%s3109_s0 + $0x80] sm:$0xff] }
 0x425   :  { %1010 = vmatpush1.msra.mxu0 %v2855_v12  ;;  %1043 = vmatprep.mubr.f32.mxu0 %v3253_v18 }
 0x426   :  { %1081 = vmatpush1.msra.mxu1 %v3254_v19  ;;  %1114 = vmatprep.mubr.f32.mxu1 %v3253_v18  ;;  %v1539_v19 = vld [vmem:[%s3109_s0 + $0x88] sm:$0xff] }
 0x427   :  { %1156 = vmatprep.subr.mxu0 %v2504_v20  ;;  %1227 = vmatprep.subr.mxu1 %v2865_v14  ;;  %v1541_v14 = vld [vmem:[%s3109_s0 + $0x98] sm:$0xff] }
 0x4c6   :  { %v868_v49 = vpop.f32.mrf.mxu0  ;;  %v939_v18 = vpop.f32.mrf.mxu1 }
 0x4c7   :  { %v944_v53 = vadd.f32 %v1538_v16, %v868_v49  ;;  %v946_v16 = vadd.f32 %v1540_v5, %v939_v18  ;;  %v3268_v5 = vld [vmem:[#allocation12_spill] sm:$0xff] }
 0x4c8   :  { %v870_v46 = vpop.f32.mrf.mxu0  ;;  %v941_v10 = vpop.f32.mrf.mxu1 }
 0x4c9   :  { %v1542_v60 = vmul.f32 -1.442695, %v944_v53  ;;  %v945_v20 = vadd.f32 %v1539_v19, %v870_v46  ;;  %v947_v7 = vadd.f32 %v1541_v14, %v941_v10 }
 0x4cb   :  { %1635 = vpow2.f32 %v1542_v60  ;;  %v1543_v12 = vmul.f32 -1.442695, %v945_v20  ;;  %v1544_v2 = vmul.f32 -1.442695, %v947_v7  ;;  %v2944_v7 = vld [vmem:[%s3107_s3 + $0x70] sm:$0xff] }
 0x4cc   :  { %3269 = vst [vmem:[#allocation11_spill] sm:$0xff] %v2944_v7 }
 0x4cd   :  { %1637 = vpow2.f32 %v1543_v12 }
 0x4ce   :  { %1639 = vpow2.f32 %v1544_v2 }
 0x4d8   :  { %v1636_v47 = vpop.eup %1635 }
 0x4d9   :  { %v951_v49 = vadd.f32 1.0, %v1636_v47 }
 0x4da   :  { %v1638_v53 = vpop.eup %1637 }
 0x4db   :  { %1641 = vrcp.f32 %v951_v49  ;;  %v957_v19 = vadd.f32 1.0, %v1638_v53  ;;  %v1640_v20 = vpop.eup %1639  ;;  %v2951_v49 = vld [vmem:[%s3107_s3 + $0x58] sm:$0xff]  ;;  %v3272_v53 = vld [vmem:[#allocation14_spill] sm:$0xff] }
 0x4dc   :  { %1643 = vtanh.f32 %v946_v16  ;;  %v964_v45 = vadd.f32 1.0, %v1640_v20  ;;  %v3270_v16 = vld [vmem:[#allocation7_spill] sm:$0xff]  ;;  %3271 = vst [vmem:[#allocation19_spill] sm:$0xff] %v2951_v49  ;;  %v3274_v20 = vld [vmem:[#allocation8_spill] sm:$0xff] }
 0x4dd   :  { %1645 = vrcp.f32 %v957_v19  ;;  %v2958_v19 = vld [vmem:[%s3107_s3 + $0x50] sm:$0xff] }
 0x4de   :  { %1647 = vrcp.f32 %v964_v45  ;;  %v2937_v45 = vld [vmem:[%s3107_s3 + $0x78] sm:$0xff]  ;;  %3273 = vst [vmem:[#allocation13_spill] sm:$0xff] %v2958_v19 }
 0x4df   :  { %3267 = vst [vmem:[#allocation18_spill] sm:$0xff] %v2937_v45 }
 0x4e8   :  { %v1642_v12 = vpop.eup %1641 }
 0x4e9   :  { %v1644_v46 = vpop.eup %1643 }
 0x4ea   :  { %v1646_v60 = vpop.eup %1645  ;;  %v968_v10 = vmul.f32 %v1644_v46, %v1642_v12  ;;  %v2965_v12 = vld [vmem:[%s3107_s3 + $0x38] sm:$0xff]  ;;  %v3276_v46 = vld [vmem:[#allocation16_spill] sm:$0xff] }
 0x4eb   :  { %v967_v14 = vmul.f32 %v1646_v60, %v2521_v51  ;;  %v1648_v18 = vpop.eup %1647  ;;  %v3266_v51 = vld [vmem:[#allocation6_spill] sm:$0xff]  ;;  %3275 = vst [vmem:[#allocation20_spill] sm:$0xff] %v2965_v12 }
 0x4ec   :  { %v2972_v60 = vld [vmem:[%s3107_s3 + $0x30] sm:$0xff] }
 0x4ed   :  { %v2881_v44 = vadd.f32 %v968_v10, %v967_v14  ;;  %3277 = vst [vmem:[#allocation15_spill] sm:$0xff] %v2972_v60  ;;  %v3278_v10 = vld [vmem:[#allocation9_spill] sm:$0xff]  ;;  %v2979_v14 = vld [vmem:[%s3107_s3 + $0x18] sm:$0xff] }
 0x4ee   :  { %3279 = vst [vmem:[#allocation21_spill] sm:$0xff] %v2979_v14 }
 0x4ef   :  { %1649 = vtanh.f32 %v2881_v44 }
 0x4fc   :  { %v1650_v47 = vpop.eup %1649 }
 0x4fd   :  { %v971_v2 = vmul.f32 %v1650_v47, %v1648_v18  ;;  %v3280_v18 = vld [vmem:[#allocation17_spill] sm:$0xff]  ;;  %v3281_v47 = vmov 0.0  }
 0x4ff   :  { %1545 = vst [vmem:[%s3111_s4 + $0x20] sm:$0xff] %v971_v2  ;;  %1044 = vmatmul.mubr.f32.vlgmr.msra.gmra.mxu0 %v971_v2  ;;  %1115 = vmatmul.mubr.f32.vlgmr.msra.gmra.mxu1 %v971_v2  ;;  %v2987_v2 = vld [vmem:[%s3107_s3 + $0x10] sm:$0xff] }
 0x500   :  { %1157 = vmatpush1.msra.mxu0 %v2530_v61  ;;  %1228 = vmatpush1.msra.mxu1 %v2536_v50  ;;  %3282 = vst [vmem:[#allocation5_spill] sm:$0xff] %v2987_v2 }
 0x501   :  { %1158 = vmatprep.subr.mxu0 %v2542_v9  ;;  %1229 = vmatprep.subr.mxu1 %v2548_v58 }
 0x502   :  { %1159 = vmatpush1.msra.mxu0 %v2554_v55  ;;  %1230 = vmatpush1.msra.mxu1 %v2560_v0 }
 0x503   :  { %1160 = vmatprep.subr.mxu0 %v2566_v57  ;;  %1231 = vmatprep.subr.mxu1 %v2572_v3 }
 0x504   :  { %1161 = vmatpush1.msra.mxu0 %v2578_v48  ;;  %1232 = vmatpush1.msra.mxu1 %v2584_v54 }
 0x505   :  { %1162 = vmatprep.subr.mxu0 %v2590_v62  ;;  %1233 = vmatprep.subr.mxu1 %v2596_v52 }
 0x506   :  { %1163 = vmatpush1.msra.mxu0 %v2602_v56  ;;  %1234 = vmatpush1.msra.mxu1 %v2608_v63 }
 0x507   :  { %1164 = vmatprep.subr.mxu0 %v2614_v59  ;;  %1235 = vmatprep.subr.mxu1 %v2620_v1 }
 0x508   :  { %1165 = vmatpush1.msra.mxu0 %v2626_v4  ;;  %1236 = vmatpush1.msra.mxu1 %v2632_v6 }
 0x509   :  { %1166 = vmatprep.subr.mxu0 %v2638_v8  ;;  %1237 = vmatprep.subr.mxu1 %v2644_v11 }
 0x50a   :  { %1167 = vmatpush1.msra.mxu0 %v2650_v13  ;;  %1238 = vmatpush1.msra.mxu1 %v2656_v15 }
 0x50b   :  { %1168 = vmatprep.subr.mxu0 %v2662_v17  ;;  %1239 = vmatprep.subr.mxu1 %v2668_v21 }
 0x50c   :  { %1169 = vmatpush1.msra.mxu0 %v2674_v22  ;;  %1240 = vmatpush1.msra.mxu1 %v2680_v23 }
 0x50d   :  { %1170 = vmatprep.subr.mxu0 %v2686_v24  ;;  %1241 = vmatprep.subr.mxu1 %v2692_v25 }
 0x50e   :  { %1171 = vmatpush1.msra.mxu0 %v2698_v26  ;;  %1242 = vmatpush1.msra.mxu1 %v2704_v27 }
 0x50f   :  { %1172 = vmatprep.subr.mxu0 %v2710_v28  ;;  %1243 = vmatprep.subr.mxu1 %v2716_v29 }
 0x510   :  { %1173 = vmatpush1.msra.mxu0 %v2722_v30  ;;  %1244 = vmatpush1.msra.mxu1 %v2728_v31 }
 0x511   :  { %1174 = vmatprep.subr.mxu0 %v2734_v32  ;;  %1245 = vmatprep.subr.mxu1 %v2740_v33 }
 0x512   :  { %1175 = vmatpush1.msra.mxu0 %v2746_v34  ;;  %1246 = vmatpush1.msra.mxu1 %v2752_v35 }
 0x513   :  { %1176 = vmatprep.subr.mxu0 %v2758_v36  ;;  %1247 = vmatprep.subr.mxu1 %v2764_v37 }
 0x514   :  { %1177 = vmatpush1.msra.mxu0 %v2770_v38  ;;  %1248 = vmatpush1.msra.mxu1 %v2776_v39 }
 0x515   :  { %1178 = vmatprep.subr.mxu0 %v2782_v40  ;;  %1249 = vmatprep.subr.mxu1 %v2788_v41 }
 0x516   :  { %1179 = vmatpush1.msra.mxu0 %v2794_v42  ;;  %1250 = vmatpush1.msra.mxu1 %v2800_v43 }
 0x517   :  { %1180 = vmatprep.subr.mxu0 %v3266_v51  ;;  %1251 = vmatprep.subr.mxu1 %v2937_v45 }
 0x518   :  { %1181 = vmatpush1.msra.mxu0 %v3268_v5  ;;  %1252 = vmatpush1.msra.mxu1 %v2944_v7 }
 0x519   :  { %1182 = vmatprep.subr.mxu0 %v3270_v16  ;;  %1253 = vmatprep.subr.mxu1 %v2951_v49  ;;  %v1548_v16 = vld [vmem:[%s3109_s0 + $0xb0] sm:$0xff] }
 0x51a   :  { %1183 = vmatpush1.msra.mxu0 %v3272_v53  ;;  %1254 = vmatpush1.msra.mxu1 %v2958_v19 }
 0x51b   :  { %1184 = vmatprep.subr.mxu0 %v3274_v20  ;;  %1255 = vmatprep.subr.mxu1 %v2965_v12 }
 0x51c   :  { %1185 = vmatpush1.msra.mxu0 %v3276_v46  ;;  %1256 = vmatpush1.msra.mxu1 %v2972_v60  ;;  %v3284_v60 = vld [vmem:[#allocation10_spill] sm:$0xff]  ;;  %v1547_v46 = vld [vmem:[%s3109_s0 + $0xa8] sm:$0xff] }
 0x51d   :  { %1186 = vmatprep.subr.mxu0 %v3278_v10  ;;  %1257 = vmatprep.subr.mxu1 %v2979_v14  ;;  %v3283_v10 = vld [vmem:[#allocation4_spill] sm:$0xff] }
 0x51e   :  { %1187 = vmatpush1.msra.mxu0 %v3280_v18  ;;  %1220 = vmatprep.mubr.f32.mxu0 %v3281_v47  ;;  %v1546_v14 = vld [vmem:[%s3109_s0 + $0xa0] sm:$0xff] }
 0x51f   :  { %1258 = vmatpush1.msra.mxu1 %v2987_v2  ;;  %1291 = vmatprep.mubr.f32.mxu1 %v3281_v47 }
 0x520   :  { %1333 = vmatprep.subr.mxu0 %v3283_v10  ;;  %1404 = vmatprep.subr.mxu1 %v3284_v60  ;;  %v1549_v60 = vld [vmem:[%s3109_s0 + $0xb8] sm:$0xff] }
 0x5bf   :  { %v1045_v18 = vpop.f32.mrf.mxu0  ;;  %v1116_v2 = vpop.f32.mrf.mxu1 }
 0x5c0   :  { %v1121_v12 = vadd.f32 %v1546_v14, %v1045_v18  ;;  %v1123_v14 = vadd.f32 %v1548_v16, %v1116_v2 }
 0x5c1   :  { %v1047_v20 = vpop.f32.mrf.mxu0  ;;  %v1118_v10 = vpop.f32.mrf.mxu1 }
 0x5c2   :  { %v1550_v19 = vmul.f32 -1.442695, %v1121_v12  ;;  %v1122_v53 = vadd.f32 %v1547_v46, %v1047_v20  ;;  %v1124_v49 = vadd.f32 %v1549_v60, %v1118_v10 }
 0x5c4   :  { %1651 = vpow2.f32 %v1550_v19  ;;  %v1551_v47 = vmul.f32 -1.442695, %v1122_v53  ;;  %v1552_v7 = vmul.f32 -1.442695, %v1124_v49 }
 0x5c6   :  { %1653 = vpow2.f32 %v1551_v47 }
 0x5c7   :  { %1655 = vpow2.f32 %v1552_v7 }
 0x5d1   :  { %v1652_v5 = vpop.eup %1651 }
 0x5d2   :  { %v1128_v18 = vadd.f32 1.0, %v1652_v5 }
 0x5d3   :  { %v1654_v12 = vpop.eup %1653 }
 0x5d4   :  { %1657 = vrcp.f32 %v1128_v18  ;;  %v1134_v19 = vadd.f32 1.0, %v1654_v12  ;;  %v1656_v53 = vpop.eup %1655 }
 0x5d5   :  { %1659 = vtanh.f32 %v1123_v14  ;;  %v1141_v45 = vadd.f32 1.0, %v1656_v53 }
 0x5d6   :  { %1661 = vrcp.f32 %v1134_v19 }
 0x5d7   :  { %1663 = vrcp.f32 %v1141_v45  ;;  %v1562_v45 = vld [vmem:[%s3109_s0 + $0xe0] sm:$0xff] }
 0x5e1   :  { %v1658_v20 = vpop.eup %1657 }
 0x5e2   :  { %v1660_v46 = vpop.eup %1659 }
 0x5e3   :  { %v1662_v47 = vpop.eup %1661  ;;  %v1145_v60 = vmul.f32 %v1660_v46, %v1658_v20  ;;  %v1565_v20 = vld [vmem:[%s3109_s0 + $0xf8] sm:$0xff] }
 0x5e4   :  { %v1144_v10 = vmul.f32 %v1662_v47, %v2881_v44  ;;  %v1664_v5 = vpop.eup %1663 }
 0x5e6   :  { %v3006_v51 = vadd.f32 %v1145_v60, %v1144_v10  ;;  %v1564_v60 = vld [vmem:[%s3109_s0 + $0xf0] sm:$0xff] }
 0x5e8   :  { %1665 = vtanh.f32 %v3006_v51 }
 0x5f5   :  { %v1666_v16 = vpop.eup %1665 }
 0x5f6   :  { %v1148_v7 = vmul.f32 %v1666_v16, %v1664_v5 }
 0x5f8   :  { %1553 = vst [vmem:[%s3111_s4 + $0x28] sm:$0xff] %v1148_v7  ;;  %1221 = vmatmul.mubr.f32.vlgmr.msra.gmra.mxu0 %v1148_v7  ;;  %1292 = vmatmul.mubr.f32.vlgmr.msra.gmra.mxu1 %v1148_v7 }
 0x5f9   :  { %1334 = vmatpush1.msra.mxu0 %v2530_v61  ;;  %1405 = vmatpush1.msra.mxu1 %v2536_v50  ;;  %v3285_v61 = vld [vmem:[#allocation6_spill] sm:$0xff] }
 0x5fa   :  { %1335 = vmatprep.subr.mxu0 %v2542_v9  ;;  %1406 = vmatprep.subr.mxu1 %v2548_v58  ;;  %v3286_v50 = vld [vmem:[#allocation18_spill] sm:$0xff]  ;;  %v3287_v9 = vld [vmem:[#allocation12_spill] sm:$0xff]  ;;  %v3288_v58 = vld [vmem:[#allocation11_spill] sm:$0xff] }
 0x5fb   :  { %1336 = vmatpush1.msra.mxu0 %v2554_v55  ;;  %1407 = vmatpush1.msra.mxu1 %v2560_v0  ;;  %v3289_v55 = vld [vmem:[#allocation7_spill] sm:$0xff] }
 0x5fc   :  { %1337 = vmatprep.subr.mxu0 %v2566_v57  ;;  %1408 = vmatprep.subr.mxu1 %v2572_v3  ;;  %v3290_v0 = vld [vmem:[#allocation19_spill] sm:$0xff]  ;;  %v3291_v57 = vld [vmem:[#allocation14_spill] sm:$0xff]  ;;  %v3292_v3 = vld [vmem:[#allocation13_spill] sm:$0xff] }
 0x5fd   :  { %1338 = vmatpush1.msra.mxu0 %v2578_v48  ;;  %1409 = vmatpush1.msra.mxu1 %v2584_v54  ;;  %v3293_v48 = vld [vmem:[#allocation8_spill] sm:$0xff] }
 0x5fe   :  { %1339 = vmatprep.subr.mxu0 %v2590_v62  ;;  %1410 = vmatprep.subr.mxu1 %v2596_v52  ;;  %v3294_v54 = vld [vmem:[#allocation20_spill] sm:$0xff]  ;;  %v3296_v52 = vld [vmem:[#allocation15_spill] sm:$0xff] }
 0x5ff   :  { %1340 = vmatpush1.msra.mxu0 %v2602_v56  ;;  %1411 = vmatpush1.msra.mxu1 %v2608_v63  ;;  %v3295_v62 = vld [vmem:[#allocation16_spill] sm:$0xff]  ;;  %v3297_v56 = vld [vmem:[#allocation9_spill] sm:$0xff] }
 0x600   :  { %1341 = vmatprep.subr.mxu0 %v2614_v59  ;;  %1412 = vmatprep.subr.mxu1 %v2620_v1  ;;  %v3298_v63 = vld [vmem:[#allocation21_spill] sm:$0xff]  ;;  %v3300_v1 = vmov 0.0  }
 0x601   :  { %1342 = vmatpush1.msra.mxu0 %v2626_v4  ;;  %1413 = vmatpush1.msra.mxu1 %v2632_v6  ;;  %v3299_v59 = vld [vmem:[#allocation17_spill] sm:$0xff]  ;;  %v1554_v6 = vld [vmem:[%s3109_s0 + $0xc0] sm:$0xff] }
 0x602   :  { %1343 = vmatprep.subr.mxu0 %v2638_v8  ;;  %1414 = vmatprep.subr.mxu1 %v2644_v11  ;;  %v3301_v4 = vld [vmem:[#allocation5_spill] sm:$0xff] }
 0x603   :  { %1344 = vmatpush1.msra.mxu0 %v2650_v13  ;;  %1415 = vmatpush1.msra.mxu1 %v2656_v15  ;;  %v1555_v11 = vld [vmem:[%s3109_s0 + $0xc8] sm:$0xff] }
 0x604   :  { %1345 = vmatprep.subr.mxu0 %v2662_v17  ;;  %1416 = vmatprep.subr.mxu1 %v2668_v21 }
 0x605   :  { %1346 = vmatpush1.msra.mxu0 %v2674_v22  ;;  %1417 = vmatpush1.msra.mxu1 %v2680_v23 }
 0x606   :  { %1347 = vmatprep.subr.mxu0 %v2686_v24  ;;  %1418 = vmatprep.subr.mxu1 %v2692_v25  ;;  %v1557_v24 = vld [vmem:[%s3109_s0 + $0xd8] sm:$0xff] }
 0x607   :  { %1348 = vmatpush1.msra.mxu0 %v2698_v26  ;;  %1419 = vmatpush1.msra.mxu1 %v2704_v27  ;;  %v1556_v27 = vld [vmem:[%s3109_s0 + $0xd0] sm:$0xff] }
 0x608   :  { %1349 = vmatprep.subr.mxu0 %v2710_v28  ;;  %1420 = vmatprep.subr.mxu1 %v2716_v29 }
 0x609   :  { %1350 = vmatpush1.msra.mxu0 %v2722_v30  ;;  %1421 = vmatpush1.msra.mxu1 %v2728_v31 }
 0x60a   :  { %1351 = vmatprep.subr.mxu0 %v2734_v32  ;;  %1422 = vmatprep.subr.mxu1 %v2740_v33 }
 0x60b   :  { %1352 = vmatpush1.msra.mxu0 %v2746_v34  ;;  %1423 = vmatpush1.msra.mxu1 %v2752_v35 }
 0x60c   :  { %1353 = vmatprep.subr.mxu0 %v2758_v36  ;;  %1424 = vmatprep.subr.mxu1 %v2764_v37 }
 0x60d   :  { %1354 = vmatpush1.msra.mxu0 %v2770_v38  ;;  %1425 = vmatpush1.msra.mxu1 %v2776_v39 }
 0x60e   :  { %1355 = vmatprep.subr.mxu0 %v2782_v40  ;;  %1426 = vmatprep.subr.mxu1 %v2788_v41 }
 0x60f   :  { %1356 = vmatpush1.msra.mxu0 %v2794_v42  ;;  %1427 = vmatpush1.msra.mxu1 %v2800_v43 }
 0x610   :  { %1357 = vmatprep.subr.mxu0 %v3285_v61  ;;  %1428 = vmatprep.subr.mxu1 %v3286_v50 }
 0x611   :  { %1358 = vmatpush1.msra.mxu0 %v3287_v9  ;;  %1429 = vmatpush1.msra.mxu1 %v3288_v58 }
 0x612   :  { %1359 = vmatprep.subr.mxu0 %v3289_v55  ;;  %1430 = vmatprep.subr.mxu1 %v3290_v0 }
 0x613   :  { %1360 = vmatpush1.msra.mxu0 %v3291_v57  ;;  %1431 = vmatpush1.msra.mxu1 %v3292_v3 }
 0x614   :  { %1361 = vmatprep.subr.mxu0 %v3293_v48  ;;  %1432 = vmatprep.subr.mxu1 %v3294_v54 }
 0x615   :  { %1362 = vmatpush1.msra.mxu0 %v3295_v62  ;;  %1433 = vmatpush1.msra.mxu1 %v3296_v52 }
 0x616   :  { %1363 = vmatprep.subr.mxu0 %v3297_v56  ;;  %1434 = vmatprep.subr.mxu1 %v3298_v63 }
 0x617   :  { %1364 = vmatpush1.msra.mxu0 %v3299_v59  ;;  %1397 = vmatprep.mubr.f32.mxu0 %v3300_v1 }
 0x618   :  { %1435 = vmatpush1.msra.mxu1 %v3301_v4  ;;  %1468 = vmatprep.mubr.f32.mxu1 %v3300_v1 }
 0x6b8   :  { %v1222_v8 = vpop.f32.mrf.mxu0  ;;  %v1293_v22 = vpop.f32.mrf.mxu1 }
 0x6b9   :  { %v1298_v13 = vadd.f32 %v1554_v6, %v1222_v8  ;;  %v1300_v30 = vadd.f32 %v1556_v27, %v1293_v22 }
 0x6ba   :  { %v1224_v15 = vpop.f32.mrf.mxu0  ;;  %v1295_v25 = vpop.f32.mrf.mxu1 }
 0x6bb   :  { %v1558_v17 = vmul.f32 -1.442695, %v1298_v13  ;;  %v1299_v21 = vadd.f32 %v1555_v11, %v1224_v15  ;;  %v1301_v26 = vadd.f32 %v1557_v24, %v1295_v25 }
 0x6bd   :  { %1667 = vpow2.f32 %v1558_v17  ;;  %v1559_v23 = vmul.f32 -1.442695, %v1299_v21  ;;  %v1560_v28 = vmul.f32 -1.442695, %v1301_v26 }
 0x6bf   :  { %1669 = vpow2.f32 %v1559_v23 }
 0x6c0   :  { %1671 = vpow2.f32 %v1560_v28 }
 0x6ca   :  { %v1668_v29 = vpop.eup %1667 }
 0x6cb   :  { %v1305_v31 = vadd.f32 1.0, %v1668_v29 }
 0x6cc   :  { %v1670_v32 = vpop.eup %1669 }
 0x6cd   :  { %1673 = vrcp.f32 %v1305_v31  ;;  %v1311_v33 = vadd.f32 1.0, %v1670_v32  ;;  %v1672_v34 = vpop.eup %1671 }
 0x6ce   :  { %1675 = vtanh.f32 %v1300_v30  ;;  %v1318_v38 = vadd.f32 1.0, %v1672_v34 }
 0x6cf   :  { %1677 = vrcp.f32 %v1311_v33 }
 0x6d0   :  { %1679 = vrcp.f32 %v1318_v38 }
 0x6da   :  { %v1674_v35 = vpop.eup %1673 }
 0x6db   :  { %v1676_v36 = vpop.eup %1675 }
 0x6dc   :  { %v1678_v37 = vpop.eup %1677  ;;  %v1322_v39 = vmul.f32 %v1676_v36, %v1674_v35 }
 0x6dd   :  { %v1321_v40 = vmul.f32 %v1678_v37, %v3006_v51  ;;  %v1680_v42 = vpop.eup %1679  ;;  %v1563_v51 = vld [vmem:[%s3109_s0 + $0xe8] sm:$0xff] }
 0x6df   :  { %v1323_v41 = vadd.f32 %v1322_v39, %v1321_v40 }
 0x6e1   :  { %1681 = vtanh.f32 %v1323_v41 }
 0x6ee   :  { %v1682_v43 = vpop.eup %1681 }
 0x6ef   :  { %v1325_v44 = vmul.f32 %v1682_v43, %v1680_v42 }
 0x6f1   :  { %1561 = vst [vmem:[%s3111_s4 + $0x30] sm:$0xff] %v1325_v44  ;;  %1398 = vmatmul.mubr.f32.vlgmr.msra.gmra.mxu0 %v1325_v44  ;;  %1469 = vmatmul.mubr.f32.vlgmr.msra.gmra.mxu1 %v1325_v44 }
 0x7b1   :  { %v1399_v49 = vpop.f32.mrf.mxu0  ;;  %v1470_v19 = vpop.f32.mrf.mxu1 }
 0x7b2   :  { %v1475_v2 = vadd.f32 %v1562_v45, %v1399_v49  ;;  %v1477_v16 = vadd.f32 %v1564_v60, %v1470_v19 }
 0x7b3   :  { %v1401_v14 = vpop.f32.mrf.mxu0  ;;  %v1472_v46 = vpop.f32.mrf.mxu1 }
 0x7b4   :  { %v1566_v18 = vmul.f32 -1.442695, %v1475_v2  ;;  %v1476_v12 = vadd.f32 %v1563_v51, %v1401_v14  ;;  %v1478_v47 = vadd.f32 %v1565_v20, %v1472_v46 }
 0x7b6   :  { %1683 = vpow2.f32 %v1566_v18  ;;  %v1567_v53 = vmul.f32 -1.442695, %v1476_v12  ;;  %v1568_v10 = vmul.f32 -1.442695, %v1478_v47 }
 0x7b8   :  { %1685 = vpow2.f32 %v1567_v53 }
 0x7b9   :  { %1687 = vpow2.f32 %v1568_v10 }
 0x7c3   :  { %v1684_v5 = vpop.eup %1683 }
 0x7c4   :  { %v1482_v7 = vadd.f32 1.0, %v1684_v5 }
 0x7c5   :  { %v1686_v61 = vpop.eup %1685 }
 0x7c6   :  { %1689 = vrcp.f32 %v1482_v7  ;;  %v1488_v50 = vadd.f32 1.0, %v1686_v61  ;;  %v1688_v9 = vpop.eup %1687 }
 0x7c7   :  { %1691 = vtanh.f32 %v1477_v16  ;;  %v1495_v57 = vadd.f32 1.0, %v1688_v9 }
 0x7c8   :  { %1693 = vrcp.f32 %v1488_v50 }
 0x7c9   :  { %1695 = vrcp.f32 %v1495_v57 }
 0x7d3   :  { %v1690_v58 = vpop.eup %1689 }
 0x7d4   :  { %v1692_v55 = vpop.eup %1691 }
 0x7d5   :  { %v1694_v0 = vpop.eup %1693  ;;  %v1499_v3 = vmul.f32 %v1692_v55, %v1690_v58 }
 0x7d6   :  { %v1498_v48 = vmul.f32 %v1694_v0, %v1323_v41  ;;  %v1696_v62 = vpop.eup %1695 }
 0x7d8   :  { %v1500_v54 = vadd.f32 %v1499_v3, %v1498_v48 }
 0x7da   :  { %1697 = vtanh.f32 %v1500_v54 }
 0x7e7   :  { %v1698_v52 = vpop.eup %1697 }
 0x7e8   :  { %v1502_v56 = vmul.f32 %v1698_v52, %v1696_v62 }
 0x7ea   :  { %1569 = vst [vmem:[%s3111_s4 + $0x38] sm:$0xff] %v1502_v56 }

</bundles_post_ra>
